<compile_context>
chip_gen: v6e
topology: v6e:2x2x1
jax: 0.10.0
libtpu: 0.0.40
codegen_flags: <defaults>
</compile_context>

<pallas_src>
import functools

import jax
import jax.numpy as jnp
from jax.experimental import pallas as pl
from jax.experimental.pallas import tpu as pltpu

_LANE = 128


def _round_up(x, m):
    return (x + m - 1) // m * m


def _pick_row_tile(H, W, target_rows=512):
    """Largest divisor of H such that the row tile has <= target_rows output pixels."""
    best = 1
    for d in range(1, H + 1):
        if H % d == 0 and d * W <= target_rows:
            best = d
    return best


def _sphead_kernel(xp_ref, w1_ref, b1_ref, w2_ref, b2_ref, o_ref, acc_ref,
                   *, TH, W, Cinp, Cmidp, Coutp):
    """One (batch, row-tile) step.

    xp_ref : (1, H+2, W+2, Cinp) bf16   full spatially/channel padded image (block index
                                        depends only on n, so it is DMA'd once per batch)
    w1_ref : (3, 3*Cinp, Cmidp)  bf16   3x3 conv weights, [dy][dx*Cinp + cin][cmid]
    b1_ref : (1, Cmidp)          f32
    w2_ref : (Cmidp, Coutp)      bf16   1x1 conv weights
    b2_ref : (1, Coutp)          f32
    o_ref  : (1, TH*W, Coutp)           lane-dense flattened output tile
    acc_ref: (TH*W, Cmidp)       f32    VMEM scratch accumulator
    """
    i = pl.program_id(1)
    row0 = i * TH  # top padded row of this output row tile

    # 3x3 conv as 3 MXU matmuls: for each dy, concat the 3 dx-shifted slabs along the
    # (lane) channel axis -> (TH*W, 3*Cinp) and contract against (3*Cinp, Cmidp).
    for dy in range(3):
        rows = xp_ref[0, pl.ds(row0 + dy, TH)]                      # (TH, W+2, Cinp)
        slab = jnp.concatenate(
            [rows[:, dx:dx + W, :] for dx in range(3)], axis=-1)    # (TH, W, 3*Cinp)
        slab = slab.reshape(TH * W, 3 * Cinp)
        part = jnp.dot(slab, w1_ref[dy], preferred_element_type=jnp.float32)
        if dy == 0:
            acc_ref[...] = part
        else:
            acc_ref[...] += part

    # bias + ReLU (f32 on the VPU), then cast to bf16 for the 1x1-conv matmul.
    hidden = jnp.maximum(acc_ref[...] + b1_ref[...], 0.0).astype(w2_ref.dtype)
    out = jnp.dot(hidden, w2_ref[...], preferred_element_type=jnp.float32) + b2_ref[...]
    o_ref[...] = out.reshape(1, TH * W, Coutp).astype(o_ref.dtype)


def sp_head_pallas(x_nchw, w1, b1, w2, b2, *, row_tile=None):
    """SPHead forward.

    x_nchw : (N, Cin, H, W)   float32
    w1     : (Cmid, Cin, 3, 3)  conv1 weight (PyTorch OIHW)
    b1     : (Cmid,)
    w2     : (Cout, Cmid, 1, 1) conv2 weight (PyTorch OIHW)
    b2     : (Cout,)
    returns (N, Cout, H, W)
    """
    N, Cin, H, W = x_nchw.shape
    Cmid = w1.shape[0]
    Cout = w2.shape[0]

    Cinp = _round_up(Cin, _LANE)
    Cmidp = _round_up(Cmid, _LANE)
    Coutp = _round_up(Cout, _LANE)

    TH = row_tile if row_tile is not None else _pick_row_tile(H, W)
    assert H % TH == 0, "row_tile must divide H"
    assert (TH * W) % 8 == 0 or TH == H, "row tile must give sublane-aligned output blocks"
    n_row_tiles = H // TH

    # ---- wrapper glue (plain JAX): layout, padding, weight reshuffle, bf16 cast ----
    # Fused: NCHW->NHWC transpose + 1px spatial pad + channel pad to Cinp, in one pass.
    x_nhwc = jnp.transpose(x_nchw, (0, 2, 3, 1)).astype(jnp.bfloat16)     # (N,H,W,Cin)
    xp = jnp.zeros((N, H + 2, W + 2, Cinp), jnp.bfloat16)
    xp = xp.at[:, 1:H + 1, 1:W + 1, :Cin].set(x_nhwc)                     # (N,H+2,W+2,Cinp)

    # conv1 weights: OIHW -> (ky, kx, Cin, Cmid), zero-pad channels, pack dx into K.
    w1_t = jnp.transpose(w1, (2, 3, 1, 0))                                # (3,3,Cin,Cmid)
    w1_t = jnp.pad(w1_t, ((0, 0), (0, 0), (0, Cinp - Cin), (0, Cmidp - Cmid)))
    w1_t = w1_t.reshape(3, 3 * Cinp, Cmidp).astype(jnp.bfloat16)          # (3, 3*Cinp, Cmidp)

    # conv2 weights: (Cout, Cmid, 1, 1) -> (Cmid, Cout), zero-pad.
    w2_t = jnp.transpose(w2[:, :, 0, 0], (1, 0))
    w2_t = jnp.pad(w2_t, ((0, Cmidp - Cmid), (0, Coutp - Cout))).astype(jnp.bfloat16)

    b1_t = jnp.pad(b1, (0, Cmidp - Cmid)).reshape(1, Cmidp).astype(jnp.float32)
    b2_t = jnp.pad(b2, (0, Coutp - Cout)).reshape(1, Coutp).astype(jnp.float32)

    kernel = functools.partial(_sphead_kernel, TH=TH, W=W,
                               Cinp=Cinp, Cmidp=Cmidp, Coutp=Coutp)

    out_flat = pl.pallas_call(
        kernel,
        out_shape=jax.ShapeDtypeStruct((N, H * W, Coutp), x_nchw.dtype),
        grid_spec=pltpu.PrefetchScalarGridSpec(
            num_scalar_prefetch=0,
            grid=(N, n_row_tiles),
            in_specs=[
                # Full padded image per batch element (same block for every row tile ->
                # DMA'd once per n); halo rows are sliced in-kernel via pl.ds.
                pl.BlockSpec((1, H + 2, W + 2, Cinp), lambda n, i: (n, 0, 0, 0)),
                pl.BlockSpec((3, 3 * Cinp, Cmidp), lambda n, i: (0, 0, 0)),
                pl.BlockSpec((1, Cmidp), lambda n, i: (0, 0)),
                pl.BlockSpec((Cmidp, Coutp), lambda n, i: (0, 0)),
                pl.BlockSpec((1, Coutp), lambda n, i: (0, 0)),
            ],
            out_specs=pl.BlockSpec((1, TH * W, Coutp), lambda n, i: (n, i, 0)),
            scratch_shapes=[pltpu.VMEM((TH * W, Cmidp), jnp.float32)],
        ),
        compiler_params=pltpu.CompilerParams(
            dimension_semantics=("parallel", "parallel")),
    )(xp, w1_t, b1_t, w2_t, b2_t)

    # Slice off padded output channels, restore (N, Cout, H, W).
    out_nhwc = out_flat[:, :, :Cout].reshape(N, H, W, Cout)
    return jnp.transpose(out_nhwc, (0, 3, 1, 2))


def sp_head_reference(x_nchw, w1, b1, w2, b2):
    """Pure-JAX f32 reference (matches PyTorch semantics)."""
    y = jax.lax.conv_general_dilated(
        x_nchw, w1, window_strides=(1, 1), padding=((1, 1), (1, 1)),
        dimension_numbers=("NCHW", "OIHW", "NCHW"))
    y = jnp.maximum(y + b1[None, :, None, None], 0.0)
    z = jax.lax.conv_general_dilated(
        y, w2, window_strides=(1, 1), padding=((0, 0), (0, 0)),
        dimension_numbers=("NCHW", "OIHW", "NCHW"))
    return z + b2[None, :, None, None]


if __name__ == "__main__":
    # Small shapes consistent with SPHead(in_channels, mid_channels, out_channels)
    N, Cin, H, W = 2, 4, 16, 16
    Cmid, Cout = 32, 16

    key = jax.random.PRNGKey(0)
    kx, k1, kb1, k2, kb2 = jax.random.split(key, 5)

    x = jax.random.normal(kx, (N, Cin, H, W), dtype=jnp.float32)
    w1 = jax.random.normal(k1, (Cmid, Cin, 3, 3), dtype=jnp.float32) * 0.1
    b1 = jax.random.normal(kb1, (Cmid,), dtype=jnp.float32) * 0.1
    w2 = jax.random.normal(k2, (Cout, Cmid, 1, 1), dtype=jnp.float32) * 0.1
    b2 = jax.random.normal(kb2, (Cout,), dtype=jnp.float32) * 0.1

    # row_tile=8 -> grid=(N, 2): exercises the multi-row-tile path at these toy shapes.
    fwd = jax.jit(functools.partial(sp_head_pallas, row_tile=8))
    out = jax.block_until_ready(fwd(x, w1, b1, w2, b2))

    ref = jax.block_until_ready(sp_head_reference(x, w1, b1, w2, b2))
    assert out.shape == (N, Cout, H, W)
    # bf16 operands on the MXU path (f32 accumulation) -> looser tolerance vs f32 reference.
    assert jnp.allclose(out, ref, atol=5e-2, rtol=5e-2), "mismatch vs reference"

    print("KERNEL_OK")
</pallas_src>

<mosaic_0001>
module attributes {stable_mosaic.version = 11 : i64} {
  func.func @_sphead_kernel(%arg0: i32, %arg1: i32, %arg2: memref<1x18x18x128xbf16, #tpu.memory_space<vmem>>, %arg3: memref<3x384x128xbf16, #tpu.memory_space<vmem>>, %arg4: memref<1x128xf32, #tpu.memory_space<vmem>>, %arg5: memref<128x128xbf16, #tpu.memory_space<vmem>>, %arg6: memref<1x128xf32, #tpu.memory_space<vmem>>, %arg7: memref<1x128x128xf32, #tpu.memory_space<vmem>>, %arg8: memref<128x128xf32, #tpu.memory_space<vmem>>) attributes {dimension_semantics = [#tpu.dimension_semantics<parallel>, #tpu.dimension_semantics<parallel>], iteration_bounds = array<i64: 2, 2>, scalar_prefetch = 0 : i64, scratch_operands = 1 : i64, tpu.core_type = #tpu.core_type<tc>, window_params = [{transform_indices = @transform_0, window_bounds = array<i64: 1, 18, 18, 128>}, {pipeline_mode = #tpu.pipeline_mode<synchronous>, transform_indices = @transform_1, window_bounds = array<i64: 3, 384, 128>}, {pipeline_mode = #tpu.pipeline_mode<synchronous>, transform_indices = @transform_2, window_bounds = array<i64: 1, 128>}, {pipeline_mode = #tpu.pipeline_mode<synchronous>, transform_indices = @transform_3, window_bounds = array<i64: 128, 128>}, {pipeline_mode = #tpu.pipeline_mode<synchronous>, transform_indices = @transform_4, window_bounds = array<i64: 1, 128>}, {transform_indices = @transform_5, window_bounds = array<i64: 1, 128, 128>}]} {
    %c8_i32 = arith.constant 8 : i32
    %0 = arith.muli %arg1, %c8_i32 : i32
    %c0_i32 = arith.constant 0 : i32
    %1 = arith.addi %0, %c0_i32 : i32
    %c0 = arith.constant 0 : index
    %2 = arith.index_cast %1 : i32 to index
    %c0_0 = arith.constant 0 : index
    %c0_1 = arith.constant 0 : index
    %3 = vector.load %arg2[%c0, %2, %c0_0, %c0_1] : memref<1x18x18x128xbf16, #tpu.memory_space<vmem>>, vector<1x8x18x128xbf16>
    %4 = vector.shape_cast %3 : vector<1x8x18x128xbf16> to vector<8x18x128xbf16>
    %5 = vector.extract_strided_slice %4 {offsets = [0, 0, 0], sizes = [8, 16, 128], strides = [1, 1, 1]} : vector<8x18x128xbf16> to vector<8x16x128xbf16>
    %6 = vector.extract_strided_slice %4 {offsets = [0, 1, 0], sizes = [8, 16, 128], strides = [1, 1, 1]} : vector<8x18x128xbf16> to vector<8x16x128xbf16>
    %7 = vector.extract_strided_slice %4 {offsets = [0, 2, 0], sizes = [8, 16, 128], strides = [1, 1, 1]} : vector<8x18x128xbf16> to vector<8x16x128xbf16>
    %8 = tpu.concatenate %5, %6, %7 in 2 : vector<8x16x128xbf16>, vector<8x16x128xbf16>, vector<8x16x128xbf16> -> vector<8x16x384xbf16>
    %9 = vector.shape_cast %8 : vector<8x16x384xbf16> to vector<128x384xbf16>
    %c0_2 = arith.constant 0 : index
    %c0_3 = arith.constant 0 : index
    %c0_4 = arith.constant 0 : index
    %10 = vector.load %arg3[%c0_2, %c0_3, %c0_4] : memref<3x384x128xbf16, #tpu.memory_space<vmem>>, vector<1x384x128xbf16>
    %11 = vector.shape_cast %10 : vector<1x384x128xbf16> to vector<384x128xbf16>
    %cst = arith.constant dense<0.000000e+00> : vector<128x128xf32>
    %12 = tpu.matmul %9, %11, %cst {dimension_numbers = #tpu.dot_dimension_numbers<[1], [0], [0], [1], [0, 0, 1, 1], [], []>} : vector<128x384xbf16>, vector<384x128xbf16>, vector<128x128xf32> -> vector<128x128xf32>
    %c0_5 = arith.constant 0 : index
    %c0_6 = arith.constant 0 : index
    %13 = vector.load %arg8[%c0_5, %c0_6] : memref<128x128xf32, #tpu.memory_space<vmem>>, vector<128x128xf32>
    tpu.vector_store %arg8[%c0_5, %c0_6], %12 {strides = array<i32>} : memref<128x128xf32, #tpu.memory_space<vmem>>, vector<128x128xf32>,
    %c1_i32 = arith.constant 1 : i32
    %14 = arith.addi %0, %c1_i32 : i32
    %c0_7 = arith.constant 0 : index
    %15 = arith.index_cast %14 : i32 to index
    %c0_8 = arith.constant 0 : index
    %c0_9 = arith.constant 0 : index
    %16 = vector.load %arg2[%c0_7, %15, %c0_8, %c0_9] : memref<1x18x18x128xbf16, #tpu.memory_space<vmem>>, vector<1x8x18x128xbf16>
    %17 = vector.shape_cast %16 : vector<1x8x18x128xbf16> to vector<8x18x128xbf16>
    %18 = vector.extract_strided_slice %17 {offsets = [0, 0, 0], sizes = [8, 16, 128], strides = [1, 1, 1]} : vector<8x18x128xbf16> to vector<8x16x128xbf16>
    %19 = vector.extract_strided_slice %17 {offsets = [0, 1, 0], sizes = [8, 16, 128], strides = [1, 1, 1]} : vector<8x18x128xbf16> to vector<8x16x128xbf16>
    %20 = vector.extract_strided_slice %17 {offsets = [0, 2, 0], sizes = [8, 16, 128], strides = [1, 1, 1]} : vector<8x18x128xbf16> to vector<8x16x128xbf16>
    %21 = tpu.concatenate %18, %19, %20 in 2 : vector<8x16x128xbf16>, vector<8x16x128xbf16>, vector<8x16x128xbf16> -> vector<8x16x384xbf16>
    %22 = vector.shape_cast %21 : vector<8x16x384xbf16> to vector<128x384xbf16>
    %c1 = arith.constant 1 : index
    %c0_10 = arith.constant 0 : index
    %c0_11 = arith.constant 0 : index
    %23 = vector.load %arg3[%c1, %c0_10, %c0_11] : memref<3x384x128xbf16, #tpu.memory_space<vmem>>, vector<1x384x128xbf16>
    %24 = vector.shape_cast %23 : vector<1x384x128xbf16> to vector<384x128xbf16>
    %cst_12 = arith.constant dense<0.000000e+00> : vector<128x128xf32>
    %25 = tpu.matmul %22, %24, %cst_12 {dimension_numbers = #tpu.dot_dimension_numbers<[1], [0], [0], [1], [0, 0, 1, 1], [], []>} : vector<128x384xbf16>, vector<384x128xbf16>, vector<128x128xf32> -> vector<128x128xf32>
    %c0_13 = arith.constant 0 : index
    %c0_14 = arith.constant 0 : index
    %26 = vector.load %arg8[%c0_13, %c0_14] : memref<128x128xf32, #tpu.memory_space<vmem>>, vector<128x128xf32>
    %27 = arith.addf %26, %25 : vector<128x128xf32>
    %c0_15 = arith.constant 0 : index
    %c0_16 = arith.constant 0 : index
    %28 = vector.load %arg8[%c0_15, %c0_16] : memref<128x128xf32, #tpu.memory_space<vmem>>, vector<128x128xf32>
    tpu.vector_store %arg8[%c0_15, %c0_16], %27 {strides = array<i32>} : memref<128x128xf32, #tpu.memory_space<vmem>>, vector<128x128xf32>,
    %c2_i32 = arith.constant 2 : i32
    %29 = arith.addi %0, %c2_i32 : i32
    %c0_17 = arith.constant 0 : index
    %30 = arith.index_cast %29 : i32 to index
    %c0_18 = arith.constant 0 : index
    %c0_19 = arith.constant 0 : index
    %31 = vector.load %arg2[%c0_17, %30, %c0_18, %c0_19] : memref<1x18x18x128xbf16, #tpu.memory_space<vmem>>, vector<1x8x18x128xbf16>
    %32 = vector.shape_cast %31 : vector<1x8x18x128xbf16> to vector<8x18x128xbf16>
    %33 = vector.extract_strided_slice %32 {offsets = [0, 0, 0], sizes = [8, 16, 128], strides = [1, 1, 1]} : vector<8x18x128xbf16> to vector<8x16x128xbf16>
    %34 = vector.extract_strided_slice %32 {offsets = [0, 1, 0], sizes = [8, 16, 128], strides = [1, 1, 1]} : vector<8x18x128xbf16> to vector<8x16x128xbf16>
    %35 = vector.extract_strided_slice %32 {offsets = [0, 2, 0], sizes = [8, 16, 128], strides = [1, 1, 1]} : vector<8x18x128xbf16> to vector<8x16x128xbf16>
    %36 = tpu.concatenate %33, %34, %35 in 2 : vector<8x16x128xbf16>, vector<8x16x128xbf16>, vector<8x16x128xbf16> -> vector<8x16x384xbf16>
    %37 = vector.shape_cast %36 : vector<8x16x384xbf16> to vector<128x384xbf16>
    %c2 = arith.constant 2 : index
    %c0_20 = arith.constant 0 : index
    %c0_21 = arith.constant 0 : index
    %38 = vector.load %arg3[%c2, %c0_20, %c0_21] : memref<3x384x128xbf16, #tpu.memory_space<vmem>>, vector<1x384x128xbf16>
    %39 = vector.shape_cast %38 : vector<1x384x128xbf16> to vector<384x128xbf16>
    %cst_22 = arith.constant dense<0.000000e+00> : vector<128x128xf32>
    %40 = tpu.matmul %37, %39, %cst_22 {dimension_numbers = #tpu.dot_dimension_numbers<[1], [0], [0], [1], [0, 0, 1, 1], [], []>} : vector<128x384xbf16>, vector<384x128xbf16>, vector<128x128xf32> -> vector<128x128xf32>
    %c0_23 = arith.constant 0 : index
    %c0_24 = arith.constant 0 : index
    %41 = vector.load %arg8[%c0_23, %c0_24] : memref<128x128xf32, #tpu.memory_space<vmem>>, vector<128x128xf32>
    %42 = arith.addf %41, %40 : vector<128x128xf32>
    %c0_25 = arith.constant 0 : index
    %c0_26 = arith.constant 0 : index
    %43 = vector.load %arg8[%c0_25, %c0_26] : memref<128x128xf32, #tpu.memory_space<vmem>>, vector<128x128xf32>
    tpu.vector_store %arg8[%c0_25, %c0_26], %42 {strides = array<i32>} : memref<128x128xf32, #tpu.memory_space<vmem>>, vector<128x128xf32>,
    %c0_27 = arith.constant 0 : index
    %c0_28 = arith.constant 0 : index
    %44 = vector.load %arg8[%c0_27, %c0_28] : memref<128x128xf32, #tpu.memory_space<vmem>>, vector<128x128xf32>
    %c0_29 = arith.constant 0 : index
    %c0_30 = arith.constant 0 : index
    %45 = vector.load %arg4[%c0_29, %c0_30] : memref<1x128xf32, #tpu.memory_space<vmem>>, vector<1x128xf32>
    %46 = vector.broadcast %45 : vector<1x128xf32> to vector<128x128xf32>
    %47 = arith.addf %44, %46 : vector<128x128xf32>
    %cst_31 = arith.constant 0.000000e+00 : f32
    %48 = vector.broadcast %cst_31 : f32 to vector<128x128xf32>
    %49 = arith.maximumf %47, %48 : vector<128x128xf32>
    %50 = arith.truncf %49 : vector<128x128xf32> to vector<128x128xbf16>
    %c0_32 = arith.constant 0 : index
    %c0_33 = arith.constant 0 : index
    %51 = vector.load %arg5[%c0_32, %c0_33] : memref<128x128xbf16, #tpu.memory_space<vmem>>, vector<128x128xbf16>
    %cst_34 = arith.constant dense<0.000000e+00> : vector<128x128xf32>
    %52 = tpu.matmul %50, %51, %cst_34 {dimension_numbers = #tpu.dot_dimension_numbers<[1], [0], [0], [1], [0, 0, 1, 1], [], []>} : vector<128x128xbf16>, vector<128x128xbf16>, vector<128x128xf32> -> vector<128x128xf32>
    %c0_35 = arith.constant 0 : index
    %c0_36 = arith.constant 0 : index
    %53 = vector.load %arg6[%c0_35, %c0_36] : memref<1x128xf32, #tpu.memory_space<vmem>>, vector<1x128xf32>
    %54 = vector.broadcast %53 : vector<1x128xf32> to vector<128x128xf32>
    %55 = arith.addf %52, %54 : vector<128x128xf32>
    %56 = vector.shape_cast %55 : vector<128x128xf32> to vector<1x128x128xf32>
    %c0_37 = arith.constant 0 : index
    %c0_38 = arith.constant 0 : index
    %c0_39 = arith.constant 0 : index
    %57 = vector.load %arg7[%c0_37, %c0_38, %c0_39] : memref<1x128x128xf32, #tpu.memory_space<vmem>>, vector<1x128x128xf32>
    tpu.vector_store %arg7[%c0_37, %c0_38, %c0_39], %56 {strides = array<i32>} : memref<1x128x128xf32, #tpu.memory_space<vmem>>, vector<1x128x128xf32>,
    return
  }
  func.func @transform_0(%arg0: i32, %arg1: i32) -> (i32, i32, i32, i32) {
    %c0_i32 = arith.constant 0 : i32
    %c0_i32_0 = arith.constant 0 : i32
    %c0_i32_1 = arith.constant 0 : i32
    %c0_i32_2 = arith.constant 0 : i32
    return %arg0, %c0_i32, %c0_i32_0, %c0_i32_1 : i32, i32, i32, i32
  }
  func.func @transform_1(%arg0: i32, %arg1: i32) -> (i32, i32, i32) {
    %c0_i32 = arith.constant 0 : i32
    %c0_i32_0 = arith.constant 0 : i32
    %c0_i32_1 = arith.constant 0 : i32
    %c0_i32_2 = arith.constant 0 : i32
    return %c0_i32, %c0_i32_0, %c0_i32_1 : i32, i32, i32
  }
  func.func @transform_2(%arg0: i32, %arg1: i32) -> (i32, i32) {
    %c0_i32 = arith.constant 0 : i32
    %c0_i32_0 = arith.constant 0 : i32
    %c0_i32_1 = arith.constant 0 : i32
    return %c0_i32, %c0_i32_0 : i32, i32
  }
  func.func @transform_3(%arg0: i32, %arg1: i32) -> (i32, i32) {
    %c0_i32 = arith.constant 0 : i32
    %c0_i32_0 = arith.constant 0 : i32
    %c0_i32_1 = arith.constant 0 : i32
    return %c0_i32, %c0_i32_0 : i32, i32
  }
  func.func @transform_4(%arg0: i32, %arg1: i32) -> (i32, i32) {
    %c0_i32 = arith.constant 0 : i32
    %c0_i32_0 = arith.constant 0 : i32
    %c0_i32_1 = arith.constant 0 : i32
    return %c0_i32, %c0_i32_0 : i32, i32
  }
  func.func @transform_5(%arg0: i32, %arg1: i32) -> (i32, i32, i32) {
    %c0_i32 = arith.constant 0 : i32
    %c0_i32_0 = arith.constant 0 : i32
    return %arg0, %arg1, %c0_i32 : i32, i32, i32
  }
}

</mosaic_0001>

<bundles_post_ra>
// kernel: sp_head_pallas.1
= control target key start
LH: loop header
LB: loop body
LE: loop exit
PB: predicated region body
PF: predicated region fallthrough
CT: control target
= control target key end

     0   :  { %s3488_s18 = smov 0   ;;  %s3490_s19 = smov 0   ;;  %s4216_s0 = inlined_call_operand.vmem [shape: bf16[2,18,18,128], index: 0, kind: input, shape index: {}]   ;;  %s4217_s1 = inlined_call_operand.vmem [shape: bf16[3,384,128], index: 1, kind: input, shape index: {}]   ;;  %s4218_s2 = inlined_call_operand.vmem [shape: f32[1,128], index: 2, kind: input, shape index: {}]   ;;  %s4219_s3 = inlined_call_operand.vmem [shape: bf16[128,128], index: 3, kind: input, shape index: {}]   ;;  %s4220_s4 = inlined_call_operand.vmem [shape: f32[1,128], index: 4, kind: input, shape index: {}]   ;;  %s4221_s5 = inlined_call_operand.vmem [shape: f32[2,256,128], index: 5, kind: output, shape index: {}]  }
   0x1   :  { %s3492_s20 = smov 0   ;;  %s3494_s21 = smov 0  }
   0x2   :  { %s3496_s22 = smov 0  }
   0x3 LB: > { %s24_s23 = sadd.s32 1, %s3448_s20  ;;  %s27_s24 = sadd.s32 1, %s3452_s21  ;;  %s3456_s22 = sphi %s3496_s22, %s15_s22   ;;  %s3452_s21 = sphi %s3494_s21, %s4225_s21   ;;  %s3448_s20 = sphi %s3492_s20, %s4224_s20   ;;  %s3444_s19 = sphi %s3490_s19, %s4223_s19   ;;  %s3440_s18 = sphi %s3488_s18, %s4222_s18  }
   0x4   : > { %p25_p0 = scmp.ge.s32.totalorder %s24_s23, 2  ;;  %p2576_p1 = scmp.ge.s32.totalorder %s3456_s22, 1 }
   0x5   : > { %p201_p2 = scmp.lt.s32.totalorder %s3456_s22, 5 }
   0x6   : > { %s4227_s23 = smov (%p25_p0, %s24_s23), 0  ;;  %s4229_s24 = smov (!%p25_p0, %s27_s24), %s3452_s21 }
   0x7   : > { %p202_p3 = pnand %p2576_p1, %p201_p2  ;;  %p29_p4 = scmp.ge.s32.totalorder %s4229_s24, 2 }
   0x8   : > { %p233_p5 = scmp.lt.s32.totalorder (!%p202_p3), %s3444_s19, 1  ;;  %s2864_s17 = smul.u32 (!%p202_p3), 96, %s3440_s18 }
   0x9   : > { %s4231_s24 = smov (%p29_p4, %s4229_s24), 0  ;;  %205 = sbr.rel (%p202_p3) target bundleno = 613 (0x265), region = 40 }
   0xe   : > { %v3290_v0 = vld [vmem:[%s4217_s1 + $0x78] sm:$0xff]   ;;  %v3293_v3 = vld [vmem:[%s4217_s1 + $0x70] sm:$0xff]   ;;  %v3296_v6 = vld [vmem:[%s4217_s1 + $0x68] sm:$0xff]   ;;  %s4233_s19 = smov (!%p233_p5, %s3444_s19), 1  ;;  %vm454_vm0 = vcmask 1046528  }
   0xf   : > { %v3291_v1 = vld [vmem:[%s4217_s1 + $0xb8] sm:$0xff]   ;;  %2865 = vmatprep.subr.bf16.mxu0 %v3290_v0  ;;  %v3294_v4 = vld [vmem:[%s4217_s1 + $0xb0] sm:$0xff]   ;;  %v3297_v7 = vld [vmem:[%s4217_s1 + $0xa8] sm:$0xff]   ;;  %s3249_s12 = smul.u32 216, %s4233_s19  ;;  %vm349_vm1 = vsmask.f32 7424 }
  0x10   : > { %v3292_v2 = vld [vmem:[%s4217_s1 + $0x38] sm:$0xff]   ;;  %3121 = vmatprep.subr.bf16.mxu1 %v3291_v1  ;;  %v3295_v5 = vld [vmem:[%s4217_s1 + $0x30] sm:$0xff]   ;;  %v3298_v8 = vld [vmem:[%s4217_s1 + $0x28] sm:$0xff]   ;;  %s2579_s13 = sshll.u32 %s4233_s19, 5 }
  0x11   : > { %2866 = vmatpush3.bf16.msra.mxu0 %v3292_v2  ;;  %3122 = vmatpush3.bf16.msra.mxu1 %v3291_v1  ;;  %v3299_v9 = vld [vmem:[%s4217_s1 + $0x60] sm:$0xff]   ;;  %v3302_v12 = vld [vmem:[%s4217_s1 + $0x58] sm:$0xff]   ;;  %v3305_v15 = vld [vmem:[%s4217_s1 + $0x50] sm:$0xff]   ;;  %s237_s29 = scalar_lea.vmem %s4216_s0, %s3249_s12 }
  0x12   : > { %2867 = vmatprep.subr.bf16.mxu0 %v3293_v3  ;;  %3123 = vmatprep.subr.bf16.mxu1 %v3294_v4  ;;  %v3300_v10 = vld [vmem:[%s4217_s1 + $0xa0] sm:$0xff]   ;;  %v3303_v13 = vld [vmem:[%s4217_s1 + $0x98] sm:$0xff]   ;;  %v3306_v16 = vld [vmem:[%s4217_s1 + $0x90] sm:$0xff]   ;;  %s3594_s11 = scalar_lea.vmem %s237_s29, %s2864_s17 }
  0x13   : > { %v3301_v11 = vld [vmem:[%s4217_s1 + $0x20] sm:$0xff]   ;;  %v3304_v14 = vld [vmem:[%s4217_s1 + $0x18] sm:$0xff]   ;;  %v3307_v17 = vld [vmem:[%s4217_s1 + $0x10] sm:$0xff]  }
  0x14   : > { %v3308_v18 = vld [vmem:[%s4217_s1 + $0x48] sm:$0xff]   ;;  %v3311_v21 = vld [vmem:[%s4217_s1 + $0x40] sm:$0xff]   ;;  %v3318_v31 = vld [vmem:[%s4217_s1 + $0x138] sm:$0xff]  }
  0x15   : > { %2868 = vmatpush3.bf16.msra.mxu0 %v3295_v5  ;;  %3124 = vmatpush3.bf16.msra.mxu1 %v3294_v4  ;;  %v3309_v19 = vld [vmem:[%s4217_s1 + $0x88] sm:$0xff]   ;;  %v3312_v22 = vld [vmem:[%s4217_s1 + $0x80] sm:$0xff]   ;;  %v3317_v33 = vld [vmem:[%s3594_s11 + $0x14] ss:$0 sps:$4 sm:$0x11]  }
  0x16   : > { %2869 = vmatprep.subr.bf16.mxu0 %v3296_v6  ;;  %3125 = vmatprep.subr.bf16.mxu1 %v3297_v7  ;;  %v3310_v20 = vld [vmem:[%s4217_s1 + $0x8] sm:$0xff]   ;;  %v3314_v23 = vld [vmem:[%s3594_s11] sm:$0xff]   ;;  %v3319_v37 = vld [vmem:[%s4217_s1 + $0x178] sm:$0xff]   ;;  %v459_v39 = vrot.slane %v3317_v33, 1  ;;  %v370_v47 = vshll.u32 %v3317_v33, 16 }
  0x17   : > { %v3315_v24 = vld [vmem:[%s3594_s11 + $0x8] ss:$0 sps:$4 sm:$0x11]   ;;  %v3313_v25 = vld [vmem:[%s4217_s1] sm:$0xff]   ;;  %v351_v26 = vshrl.u32 %v3314_v23, 16  ;;  %v353_v27 = vshll.u32 %v3314_v23, 16 }
  0x18   : > { %v358_v28 = vshll.u32 %v3315_v24, 16  ;;  %v455_v29 = vrot.slane %v3314_v23, 1  ;;  %v3316_v30 = vld [vmem:[%s3594_s11 + $0xc] sm:$0xff]   ;;  %v456_v32 = vrot.slane %v3315_v24, 1  ;;  %v3320_v40 = vld [vmem:[%s4217_s1 + $0xf8] sm:$0xff]   ;;  %v372_v51 = vrot.slane %v370_v47, 1 }
  0x19   : > { %2870 = vmatpush3.bf16.msra.mxu0 %v3298_v8  ;;  %3126 = vmatpush3.bf16.msra.mxu1 %v3297_v7  ;;  %v355_v34 = vrot.slane %v353_v27, 1  ;;  %v458_v36 = vrot.slane %v3316_v30, 1  ;;  %v3321_v43 = vld [vmem:[%s4217_s1 + $0x130] sm:$0xff]   ;;  %v363_v45 = vshrl.u32 %v3316_v30, 16  ;;  %v365_v46 = vshll.u32 %v3316_v30, 16  ;;  %v3323_v48 = vld [vmem:[%s3594_s11 + $0x18] sm:$0xff]  }
  0x1a   : > { %2871 = vmatprep.subr.bf16.mxu0 %v3299_v9  ;;  %3127 = vmatprep.subr.bf16.mxu1 %v3300_v10  ;;  %v360_v35 = vrot.slane %v358_v28, 1  ;;  %v457_v38 = vsel %vm454_vm0, %v455_v29, %v456_v32  ;;  %v3322_v49 = vld [vmem:[%s4217_s1 + $0xf0] sm:$0xff]   ;;  %v3324_v52 = vld [vmem:[%s3594_s11 + $0x20] ss:$0 sps:$4 sm:$0x11]   ;;  %v461_v53 = vrot.slane %v3323_v48, 1 }
  0x1b   : > { %v356_v41 = vor.u32 %v355_v34, %v351_v26  ;;  %3137 = vmatprep.mubr.bf16.mxu1 %v457_v38  ;;  %v460_v42 = vsel %vm454_vm0, %v458_v36, %v459_v39  ;;  %v367_v50 = vrot.slane %v365_v46, 1  ;;  %v462_v55 = vrot.slane %v3324_v52, 1  ;;  %v3630_v56 = vld [vmem:[%s3594_s11 + $0x24] sm:$0xff]   ;;  %v3326_v57 = vld [vmem:[%s3594_s11 + $0x2c] ss:$0 sps:$4 sm:$0x11]  }
  0x1c   : > { %v3327_v58 = vld [vmem:[%s4217_s1 + $0x128] sm:$0xff]   ;;  %v464_v61 = vrot.slane %v3630_v56, 1  ;;  %v465_v62 = vrot.slane %v3326_v57, 1  ;;  %v3328_v63 = vld [vmem:[%s4217_s1 + $0x170] sm:$0xff]   ;;  %v3330_v2 = vld [vmem:[%s4217_s1 + $0x120] sm:$0xff]   ;;  %v375_v3 = vshrl.u32 %v3323_v48, 16 }
  0x1d   : > { %2872 = vmatpush3.bf16.msra.mxu0 %v3301_v11  ;;  %3128 = vmatpush3.bf16.msra.mxu1 %v3300_v10  ;;  %v361_v44 = vsel %vm349_vm1, %v356_v41, %v360_v35  ;;  %v368_v54 = vor.u32 %v367_v50, %v363_v45  ;;  %v463_v60 = vsel %vm454_vm0, %v461_v53, %v462_v55  ;;  %v3329_v0 = vld [vmem:[%s4217_s1 + $0xe8] sm:$0xff]   ;;  %v3331_v4 = vld [vmem:[%s4217_s1 + $0xe0] sm:$0xff]   ;;  %v377_v5 = vshll.u32 %v3323_v48, 16  ;;  %v3653_v7 = vld [vmem:[%s3594_s11 + $0x30] sm:$0xff]  }
  0x1e   : > { %2873 = vmatprep.subr.bf16.mxu0 %v3302_v12  ;;  %3129 = vmatprep.subr.bf16.mxu1 %v3303_v13  ;;  %v466_v1 = vsel %vm454_vm0, %v464_v61, %v465_v62  ;;  %v382_v6 = vshll.u32 %v3324_v52, 16  ;;  %v3656_v10 = vld [vmem:[%s3594_s11 + $0x38] ss:$0 sps:$4 sm:$0x11]   ;;  %v467_v11 = vrot.slane %v3653_v7, 1  ;;  %v3339_v24 = vld [vmem:[%s4217_s1 + $0x110] sm:$0xff]  }
  0x1f   : > { %711 = vmatprep.mubr.bf16.mxu0 %v361_v44  ;;  %v373_v59 = vsel %vm349_vm1, %v368_v54, %v372_v51  ;;  %v379_v8 = vrot.slane %v377_v5, 1  ;;  %v3340_v26 = vld [vmem:[%s4217_s1 + $0xd0] sm:$0xff]   ;;  %v389_v27 = vshll.u32 %v3630_v56, 16  ;;  %v394_v28 = vshll.u32 %v3326_v57, 16  ;;  %v3689_v29 = vld [vmem:[%s3594_s11 + $0x48] sm:$0xff]   ;;  %v3348_v46 = vld [vmem:[%s4217_s1 + $0x100] sm:$0xff]  }
  0x20   : > { %v384_v9 = vrot.slane %v382_v6, 1  ;;  %v3692_v32 = vld [vmem:[%s3594_s11 + $0x50] ss:$0 sps:$4 sm:$0x11]   ;;  %v473_v33 = vrot.slane %v3689_v29, 1  ;;  %v3697_v36 = vld [vmem:[%s3594_s11 + $0x54] sm:$0xff]  }
  0x21   : > { %2874 = vmatpush3.bf16.msra.mxu0 %v3304_v14  ;;  %3130 = vmatpush3.bf16.msra.mxu1 %v3303_v13  ;;  %v380_v12 = vor.u32 %v379_v8, %v375_v3  ;;  %v468_v13 = vrot.slane %v3656_v10, 1  ;;  %v3661_v14 = vld [vmem:[%s3594_s11 + $0x3c] sm:$0xff]   ;;  %v474_v35 = vrot.slane %v3692_v32, 1  ;;  %v3345_v38 = vld [vmem:[%s4217_s1 + $0x108] sm:$0xff]   ;;  %v476_v41 = vrot.slane %v3697_v36, 1 }
  0x22   : > { %2875 = vmatprep.subr.bf16.mxu0 %v3305_v15  ;;  %3131 = vmatprep.subr.bf16.mxu1 %v3306_v16  ;;  %v3664_v15 = vld [vmem:[%s3594_s11 + $0x44] ss:$0 sps:$4 sm:$0x11]   ;;  %v3347_v44 = vld [vmem:[%s4217_s1 + $0xc8] sm:$0xff]   ;;  %v399_v47 = vshrl.u32 %v3653_v7, 16  ;;  %v406_v50 = vshll.u32 %v3656_v10, 16 }
  0x23   : > { %v3727_v51 = vld [vmem:[%s3594_s11 + $0xc] sm:$0xff]   ;;  %v3730_v54 = vld [vmem:[%s3594_s11 + $0x14] ss:$0 sps:$4 sm:$0x11]   ;;  %v3352_v57 = vld [vmem:[%s4217_s1 + $0x158] sm:$0xff]   ;;  %v413_v61 = vshll.u32 %v3661_v14, 16 }
  0x24   : > { %v408_v53 = vrot.slane %v406_v50, 1  ;;  %v990_v55 = vshrl.u32 %v3727_v51, 16  ;;  %v3741_v62 = vld [vmem:[%s3594_s11 + $0x18] sm:$0xff]  }
  0x25   : > { %2876 = vmatpush3.bf16.msra.mxu0 %v3307_v17  ;;  %3132 = vmatpush3.bf16.msra.mxu1 %v3306_v16  ;;  %v3336_v16 = vld [vmem:[%s4217_s1 + $0x118] sm:$0xff]   ;;  %v385_v17 = vsel %vm349_vm1, %v380_v12, %v384_v9  ;;  %v415_v3 = vrot.slane %v413_v61, 1  ;;  %v1002_v5 = vshrl.u32 %v3741_v62, 16  ;;  %v1004_v9 = vshll.u32 %v3741_v62, 16  ;;  %v3355_v12 = vld [vmem:[%s4217_s1 + $0x150] sm:$0xff]  }
  0x26   : > { %2877 = vmatprep.subr.bf16.mxu0 %v3308_v18  ;;  %3133 = vmatprep.subr.bf16.mxu1 %v3309_v19  ;;  %v469_v18 = vsel %vm454_vm0, %v467_v11, %v468_v13  ;;  %v423_v13 = vshrl.u32 %v3689_v29, 16 }
  0x29   : > { %2878 = vmatpush3.bf16.msra.mxu0 %v3310_v20  ;;  %3134 = vmatpush3.bf16.msra.mxu1 %v3309_v19  ;;  %v470_v19 = vrot.slane %v3661_v14, 1  ;;  %v471_v20 = vrot.slane %v3664_v15, 1 }
  0x2a   : > { %2879 = vmatprep.subr.bf16.mxu0 %v3311_v21  ;;  %3135 = vmatprep.subr.bf16.mxu1 %v3312_v22  ;;  %v3337_v21 = vld [vmem:[%s4217_s1 + $0x168] sm:$0xff]  }
  0x2d   : > { %2880 = vmatpush3.bf16.msra.mxu0 %v3313_v25  ;;  %3136 = vmatpush3.bf16.msra.mxu1 %v3312_v22  ;;  %v3338_v22 = vld [vmem:[%s4217_s1 + $0xd8] sm:$0xff]   ;;  %v387_v25 = vshrl.u32 %v3630_v56, 16 }
  0x2e   : > { %2945 = vmatprep.subr.bf16.mxu1 %v3318_v31  ;;  %3153 = vmatprep.subr.bf16.mxu0 %v3319_v37  ;;  %v396_v31 = vrot.slane %v394_v28, 1 }
  0x30   : > { %712 = vmatmul.mubr.bf16.vlgmr.msra.gmra.mxu0 %v3314_v23  ;;  %3138 = vmatmul.mubr.bf16.vlgmr.msra.gmra.mxu1 %v460_v42  ;;  %v472_v23 = vsel %vm454_vm0, %v470_v19, %v471_v20 }
  0x31   : > { %2946 = vmatpush3.bf16.msra.mxu1 %v3320_v40  ;;  %3154 = vmatpush3.bf16.msra.mxu0 %v3319_v37  ;;  %v3700_v37 = vld [vmem:[%s3594_s11 + $0x5c] ss:$0 sps:$4 sm:$0x11]   ;;  %v475_v40 = vsel %vm454_vm0, %v473_v33, %v474_v35  ;;  %v435_v33 = vshrl.u32 %v3697_v36, 16 }
  0x32   : > { %2947 = vmatprep.subr.bf16.mxu1 %v3321_v43  ;;  %719 = vmatprep.mubr.bf16.mxu0 %v373_v59  ;;  %v477_v42 = vrot.slane %v3700_v37, 1  ;;  %v3346_v43 = vld [vmem:[%s4217_s1 + $0x160] sm:$0xff]   ;;  %v997_v59 = vshll.u32 %v3730_v54, 16  ;;  %v442_v35 = vshll.u32 %v3700_v37, 16 }
  0x33   : > { %3141 = vmatprep.mubr.bf16.mxu1 %v463_v60  ;;  %3155 = vmatprep.subr.bf16.mxu0 %v3328_v63  ;;  %v411_v60 = vshrl.u32 %v3661_v14, 16 }
  0x34   : > { %v478_v45 = vsel %vm454_vm0, %v476_v41, %v477_v42  ;;  %v3361_v42 = vld [vmem:[%s4217_s1 + $0x140] sm:$0xff]  }
  0x35   : > { %2948 = vmatpush3.bf16.msra.mxu1 %v3322_v49  ;;  %3156 = vmatpush3.bf16.msra.mxu0 %v3328_v63  ;;  %v401_v49 = vshll.u32 %v3653_v7, 16  ;;  %v416_v10 = vor.u32 %v415_v3, %v411_v60  ;;  %v1094_v3 = vrot.slane %v3730_v54, 1  ;;  %v3374_v54 = vld [vmem:[%s4217_s1 + $0x228] sm:$0xff]  }
  0x36   : > { %2949 = vmatprep.subr.bf16.mxu1 %v3327_v58  ;;  %3157 = vmatprep.subr.bf16.mxu0 %v3337_v21 }
  0x37   : > { %v403_v52 = vrot.slane %v401_v49, 1 }
  0x38   : > { %720 = vmatmul.mubr.bf16.gmra.mxu0 %v3316_v30  ;;  %3142 = vmatmul.mubr.bf16.gmra.mxu1 %v466_v1  ;;  %v391_v30 = vrot.slane %v389_v27, 1 }
  0x39   : > { %2950 = vmatpush3.bf16.msra.mxu1 %v3329_v0  ;;  %727 = vmatprep.mubr.bf16.mxu0 %v385_v17  ;;  %v404_v58 = vor.u32 %v403_v52, %v399_v47  ;;  %v418_v0 = vshll.u32 %v3664_v15, 16  ;;  %v425_v15 = vshll.u32 %v3689_v29, 16  ;;  %v1006_v17 = vrot.slane %v1004_v9, 1 }
  0x3a   : > { %2951 = vmatprep.subr.bf16.mxu1 %v3330_v2  ;;  %3145 = vmatprep.mubr.bf16.mxu1 %v469_v18  ;;  %v392_v34 = vor.u32 %v391_v30, %v387_v25  ;;  %v999_v2 = vrot.slane %v997_v59, 1  ;;  %v430_v18 = vshll.u32 %v3692_v32, 16  ;;  %v3358_v25 = vld [vmem:[%s4217_s1 + $0x148] sm:$0xff]   ;;  %v444_v52 = vrot.slane %v442_v35, 1  ;;  %v3366_v59 = vld [vmem:[%s4217_s1 + $0x238] sm:$0xff]  }
  0x3b   : > { %3158 = vmatpush3.bf16.msra.mxu0 %v3337_v21  ;;  %v409_v1 = vsel %vm349_vm1, %v404_v58, %v408_v53  ;;  %v420_v8 = vrot.slane %v418_v0, 1  ;;  %v427_v20 = vrot.slane %v425_v15, 1  ;;  %v3761_v21 = vld [vmem:[%s3594_s11 + $0x24] sm:$0xff]  }
  0x3c   : > { %v397_v39 = vsel %vm349_vm1, %v392_v34, %v396_v31  ;;  %3159 = vmatprep.subr.bf16.mxu0 %v3346_v43  ;;  %v1014_v27 = vshrl.u32 %v3761_v21, 16  ;;  %v1016_v28 = vshll.u32 %v3761_v21, 16  ;;  %v3774_v31 = vld [vmem:[%s3594_s11 + $0x30] sm:$0xff]   ;;  %v437_v34 = vshll.u32 %v3697_v36, 16 }
  0x3d   : > { %2952 = vmatpush3.bf16.msra.mxu1 %v3331_v4  ;;  %v3746_v4 = vld [vmem:[%s3594_s11 + $0x20] ss:$0 sps:$4 sm:$0x11]   ;;  %v421_v19 = vsel %vm349_vm1, %v416_v10, %v420_v8  ;;  %v1026_v41 = vshrl.u32 %v3774_v31, 16  ;;  %v1096_v10 = vrot.slane %v3741_v62, 1 }
  0x3e   : > { %2953 = vmatprep.subr.bf16.mxu1 %v3336_v16  ;;  %v1009_v11 = vshll.u32 %v3746_v4, 16 }
  0x3f   : > { %3160 = vmatpush3.bf16.msra.mxu0 %v3346_v43  ;;  %v439_v43 = vrot.slane %v437_v34, 1 }
  0x40   : > { %728 = vmatmul.mubr.bf16.gmra.mxu0 %v3323_v48  ;;  %3146 = vmatmul.mubr.bf16.gmra.mxu1 %v472_v23  ;;  %v3349_v48 = vld [vmem:[%s4217_s1 + $0xc0] sm:$0xff]   ;;  %v1007_v23 = vor.u32 %v1006_v17, %v1002_v5  ;;  %v3817_v5 = vld [vmem:[%s3594_s11 + $0x48] sm:$0xff]  }
  0x41   : > { %2954 = vmatpush3.bf16.msra.mxu1 %v3338_v22  ;;  %735 = vmatprep.mubr.bf16.mxu0 %v397_v39  ;;  %v3764_v22 = vld [vmem:[%s3594_s11 + $0x2c] ss:$0 sps:$4 sm:$0x11]   ;;  %v1018_v39 = vrot.slane %v1016_v28, 1  ;;  %v440_v50 = vor.u32 %v439_v43, %v435_v33  ;;  %v1052_v8 = vshll.u32 %v3817_v5, 16  ;;  %v3377_v17 = vld [vmem:[%s4217_s1 + $0x220] sm:$0xff]  }
  0x42   : > { %2955 = vmatprep.subr.bf16.mxu1 %v3339_v24  ;;  %3149 = vmatprep.mubr.bf16.mxu1 %v475_v40  ;;  %v432_v24 = vrot.slane %v430_v18, 1  ;;  %v1021_v30 = vshll.u32 %v3764_v22, 16  ;;  %v3840_v18 = vld [vmem:[%s3594_s11 + $0x54] sm:$0xff]   ;;  %v3372_v33 = vld [vmem:[%s4217_s1 + $0x1e8] sm:$0xff]   ;;  %v1108_v43 = vrot.slane %v3817_v5, 1 }
  0x43   : > { %3161 = vmatprep.subr.bf16.mxu0 %v3352_v57  ;;  %v1019_v37 = vor.u32 %v1018_v39, %v1014_v27  ;;  %v445_v58 = vsel %vm349_vm1, %v440_v50, %v444_v52  ;;  %v3390_v50 = vld [vmem:[%s4217_s1 + $0x208] sm:$0xff]   ;;  %v3376_v52 = vld [vmem:[%s4217_s1 + $0x1a0] sm:$0xff]  }
  0x44   : > { %3162 = vmatpush3.bf16.msra.mxu0 %v3352_v57  ;;  %v1023_v40 = vrot.slane %v1021_v30, 1  ;;  %v3368_v30 = vld [vmem:[%s4217_s1 + $0x1b0] sm:$0xff]  }
  0x45   : > { %2956 = vmatpush3.bf16.msra.mxu1 %v3340_v26  ;;  %3163 = vmatprep.subr.bf16.mxu0 %v3355_v12  ;;  %v428_v26 = vor.u32 %v427_v20, %v423_v13  ;;  %v1050_v13 = vshrl.u32 %v3817_v5, 16 }
  0x46   : > { %2957 = vmatprep.subr.bf16.mxu1 %v3345_v38  ;;  %v1024_v49 = vsel %vm349_vm1, %v1019_v37, %v1023_v40  ;;  %v3875_v40 = vld [vmem:[%s3594_s11 + $0x60] sm:$0xff]  }
  0x47   : > { %v433_v38 = vsel %vm349_vm1, %v428_v26, %v432_v24  ;;  %v1064_v24 = vshll.u32 %v3840_v18, 16 }
  0x48   : > { %736 = vmatmul.mubr.bf16.gmra.mxu0 %v3630_v56  ;;  %3150 = vmatmul.mubr.bf16.gmra.mxu1 %v478_v45  ;;  %v992_v56 = vshll.u32 %v3727_v51, 16  ;;  %v1028_v45 = vshll.u32 %v3774_v31, 16 }
  0x49   : > { %2958 = vmatpush3.bf16.msra.mxu1 %v3347_v44  ;;  %743 = vmatprep.mubr.bf16.mxu0 %v409_v1  ;;  %v3786_v44 = vld [vmem:[%s3594_s11 + $0x38] ss:$0 sps:$4 sm:$0x11]   ;;  %v1066_v35 = vrot.slane %v1064_v24, 1 }
  0x4a   : > { %2959 = vmatprep.subr.bf16.mxu1 %v3348_v46  ;;  %v994_v63 = vrot.slane %v992_v56, 1  ;;  %3164 = vmatpush3.bf16.msra.mxu0 %v3355_v12  ;;  %v3790_v46 = vld [vmem:[%s3594_s11 + $0x3c] sm:$0xff]   ;;  %v1030_v47 = vrot.slane %v1028_v45, 1  ;;  %v1099_v12 = vrot.slane %v3761_v21, 1  ;;  %v1103_v27 = vrot.slane %v3786_v44, 1 }
  0x4b   : > { %3165 = vmatprep.subr.bf16.mxu0 %v3358_v25  ;;  %v1040_v56 = vshll.u32 %v3790_v46, 16  ;;  %v1038_v60 = vshrl.u32 %v3790_v46, 16  ;;  %v1105_v28 = vrot.slane %v3790_v46, 1 }
  0x4c   : > { %v995_v6 = vor.u32 %v994_v63, %v990_v55  ;;  %v3797_v55 = vld [vmem:[%s3594_s11 + $0x44] ss:$0 sps:$4 sm:$0x11]   ;;  %v1031_v57 = vor.u32 %v1030_v47, %v1026_v41  ;;  %v1093_v63 = vrot.slane %v3727_v51, 1  ;;  %v3373_v41 = vld [vmem:[%s4217_s1 + $0x1a8] sm:$0xff]  }
  0x4d   : > { %2960 = vmatpush3.bf16.msra.mxu1 %v3349_v48  ;;  %v1033_v48 = vshll.u32 %v3786_v44, 16  ;;  %v1042_v61 = vrot.slane %v1040_v56, 1  ;;  %v1045_v1 = vshll.u32 %v3797_v55, 16  ;;  %v1106_v39 = vrot.slane %v3797_v55, 1  ;;  %v3380_v56 = vld [vmem:[%s4217_s1 + $0x1d8] sm:$0xff]  }
  0x4e   : > { %v1000_v16 = vsel %vm349_vm1, %v995_v6, %v999_v2  ;;  %3166 = vmatpush3.bf16.msra.mxu0 %v3358_v25  ;;  %3185 = vmatprep.subr.bf16.mxu1 %v3366_v59  ;;  %v3369_v2 = vld [vmem:[%s4217_s1 + $0x230] sm:$0xff]   ;;  %v1095_v9 = vsel %vm454_vm0, %v1093_v63, %v1094_v3  ;;  %v3382_v25 = vld [vmem:[%s4217_s1 + $0x218] sm:$0xff]   ;;  %v3886_v44 = vld [vmem:[%s3594_s11 + $0x68] ss:$0 sps:$4 sm:$0x11]  }
  0x4f   : > { %1350 = vmatprep.mubr.bf16.mxu1 %v1000_v16  ;;  %3167 = vmatprep.subr.bf16.mxu0 %v3361_v42  ;;  %v1035_v53 = vrot.slane %v1033_v48, 1  ;;  %v1047_v6 = vrot.slane %v1045_v1, 1  ;;  %v1107_v48 = vsel %vm454_vm0, %v1105_v28, %v1106_v39  ;;  %v3395_v63 = vld [vmem:[%s3594_s11 + $0x20] ss:$0 sps:$4 sm:$0x11]   ;;  %v3381_v1 = vld [vmem:[%s4217_s1 + $0x198] sm:$0xff]  }
  0x50   : > { %744 = vmatmul.mubr.bf16.gmra.mxu0 %v3653_v7  ;;  %v1011_v7 = vrot.slane %v1009_v11, 1  ;;  %1351 = vmatmul.mubr.bf16.vlgmr.msra.gmra.mxu1 %v3727_v51  ;;  %v1043_v51 = vor.u32 %v1042_v61, %v1038_v60  ;;  %v1097_v11 = vrot.slane %v3746_v4, 1  ;;  %v1100_v4 = vrot.slane %v3764_v22, 1  ;;  %v3393_v60 = vld [vmem:[%s4217_s1 + $0x200] sm:$0xff]   ;;  %v3911_v61 = vld [vmem:[%s3594_s11 + $0x18] sm:$0xff]  }
  0x51   : > { %751 = vmatprep.mubr.bf16.mxu0 %v421_v19  ;;  %v1036_v0 = vsel %vm349_vm1, %v1031_v57, %v1035_v53  ;;  %3186 = vmatpush3.bf16.msra.mxu1 %v3366_v59  ;;  %v3365_v19 = vld [vmem:[%s4217_s1 + $0x1b8] sm:$0xff]   ;;  %v1111_v53 = vrot.slane %v3840_v18, 1  ;;  %v1081_v57 = vshll.u32 %v3886_v44, 16  ;;  %v3401_v39 = vld [vmem:[%s3594_s11 + $0x44] ss:$0 sps:$4 sm:$0x11]  }
  0x52   : > { %v1012_v32 = vsel %vm349_vm1, %v1007_v23, %v1011_v7  ;;  %3168 = vmatpush3.bf16.msra.mxu0 %v3361_v42  ;;  %3187 = vmatprep.subr.bf16.mxu1 %v3369_v2  ;;  %v1048_v16 = vsel %vm349_vm1, %v1043_v51, %v1047_v6  ;;  %v3367_v7 = vld [vmem:[%s4217_s1 + $0x1f0] sm:$0xff]   ;;  %v1098_v22 = vsel %vm454_vm0, %v1096_v10, %v1097_v11  ;;  %v3375_v42 = vld [vmem:[%s4217_s1 + $0x1e0] sm:$0xff]   ;;  %v1661_v6 = vshrl.u32 %v3911_v61, 16 }
  0x53   : > { %1358 = vmatprep.mubr.bf16.mxu1 %v1012_v32  ;;  %v1101_v26 = vsel %vm454_vm0, %v1099_v12, %v1100_v4  ;;  %v1083_v3 = vrot.slane %v1081_v57, 1  ;;  %v1114_v12 = vrot.slane %v3875_v40, 1  ;;  %v3397_v4 = vld [vmem:[%s3594_s11 + $0x2c] ss:$0 sps:$4 sm:$0x11]  }
  0x54   : > { %v1680_v24 = vshll.u32 %v3397_v4, 16 }
  0x55   : > { %3188 = vmatpush3.bf16.msra.mxu1 %v3369_v2 }
  0x56   : > { %3189 = vmatprep.subr.bf16.mxu1 %v3374_v54 }
  0x58   : > { %752 = vmatmul.mubr.bf16.gmra.mxu0 %v3661_v14  ;;  %1359 = vmatmul.mubr.bf16.gmra.mxu1 %v3741_v62  ;;  %v3364_v14 = vld [vmem:[%s4217_s1 + $0x1f8] sm:$0xff]   ;;  %v1054_v62 = vrot.slane %v1052_v8, 1  ;;  %v1668_v8 = vshll.u32 %v3395_v63, 16 }
  0x59   : > { %759 = vmatprep.mubr.bf16.mxu0 %v433_v38  ;;  %1366 = vmatprep.mubr.bf16.mxu1 %v1024_v49  ;;  %v3385_v38 = vld [vmem:[%s4217_s1 + $0x210] sm:$0xff]  }
  0x5a   : > { %3025 = vmatprep.subr.bf16.mxu0 %v3364_v14  ;;  %3190 = vmatpush3.bf16.msra.mxu1 %v3374_v54  ;;  %v1055_v23 = vor.u32 %v1054_v62, %v1050_v13  ;;  %v1074_v14 = vshrl.u32 %v3875_v40, 16  ;;  %v3384_v54 = vld [vmem:[%s4217_s1 + $0x190] sm:$0xff]   ;;  %v1115_v13 = vrot.slane %v3886_v44, 1  ;;  %v1670_v62 = vrot.slane %v1668_v8, 1 }
  0x5b   : > { %3191 = vmatprep.subr.bf16.mxu1 %v3377_v17 }
  0x5e   : > { %3192 = vmatpush3.bf16.msra.mxu1 %v3377_v17 }
  0x5f   : > { %3193 = vmatprep.subr.bf16.mxu1 %v3382_v25 }
  0x60   : > { %760 = vmatmul.mubr.bf16.gmra.mxu0 %v3689_v29  ;;  %1367 = vmatmul.mubr.bf16.gmra.mxu1 %v3761_v21  ;;  %v3821_v29 = vld [vmem:[%s3594_s11 + $0x50] ss:$0 sps:$4 sm:$0x11]   ;;  %v1102_v21 = vrot.slane %v3774_v31, 1 }
  0x61   : > { %767 = vmatprep.mubr.bf16.mxu0 %v445_v58  ;;  %1374 = vmatprep.mubr.bf16.mxu1 %v1036_v0  ;;  %v1057_v15 = vshll.u32 %v3821_v29, 16  ;;  %v1109_v49 = vrot.slane %v3821_v29, 1  ;;  %v1663_v29 = vshll.u32 %v3911_v61, 16 }
  0x62   : > { %3194 = vmatpush3.bf16.msra.mxu1 %v3382_v25  ;;  %v1104_v45 = vsel %vm454_vm0, %v1102_v21, %v1103_v27  ;;  %v3391_v21 = vld [vmem:[%s4217_s1 + $0x1c0] sm:$0xff]   ;;  %v3950_v25 = vld [vmem:[%s3594_s11 + $0x30] sm:$0xff]  }
  0x63   : > { %v1059_v20 = vrot.slane %v1057_v15, 1  ;;  %3195 = vmatprep.subr.bf16.mxu1 %v3385_v38  ;;  %v1110_v0 = vsel %vm454_vm0, %v1108_v43, %v1109_v49  ;;  %v1665_v10 = vrot.slane %v1663_v29, 1  ;;  %v3388_v15 = vld [vmem:[%s4217_s1 + $0x1c8] sm:$0xff]   ;;  %v3392_v27 = vld [vmem:[%s4217_s1 + $0x180] sm:$0xff]   ;;  %v1685_v44 = vshrl.u32 %v3950_v25, 16 }
  0x64   : > { %v3406_v29 = vld [vmem:[%s3594_s11 + $0x60] sm:$0xff]  }
  0x65   : > { %v1060_v34 = vsel %vm349_vm1, %v1055_v23, %v1059_v20  ;;  %v1765_v20 = vrot.slane %v3395_v63, 1  ;;  %v3405_v63 = vld [vmem:[%s3594_s11 + $0x5c] ss:$0 sps:$4 sm:$0x11]   ;;  %v1782_v8 = vrot.slane %v3406_v29, 1 }
  0x66   : > { %3196 = vmatpush3.bf16.msra.mxu1 %v3385_v38  ;;  %v1768_v38 = vrot.slane %v3397_v4, 1 }
  0x67   : > { %3197 = vmatprep.subr.bf16.mxu1 %v3390_v50 }
  0x68   : > { %768 = vmatmul.mubr.bf16.gmra.mxu0 %v3697_v36  ;;  %1375 = vmatmul.mubr.bf16.gmra.mxu1 %v3774_v31  ;;  %v3844_v36 = vld [vmem:[%s3594_s11 + $0x5c] ss:$0 sps:$4 sm:$0x11]   ;;  %v1062_v31 = vshrl.u32 %v3840_v18, 16 }
  0x69   : > { %3169 = vmatprep.mubr.bf16.mxu0 %v1095_v9  ;;  %1382 = vmatprep.mubr.bf16.mxu1 %v1048_v16  ;;  %v1069_v32 = vshll.u32 %v3844_v36, 16  ;;  %v1112_v55 = vrot.slane %v3844_v36, 1  ;;  %v3925_v9 = vld [vmem:[%s3594_s11 + $0x24] sm:$0xff]   ;;  %v1666_v16 = vor.u32 %v1665_v10, %v1661_v6  ;;  %v1780_v6 = vrot.slane %v3405_v63, 1 }
  0x6a   : > { %v1067_v37 = vor.u32 %v1066_v35, %v1062_v31  ;;  %3198 = vmatpush3.bf16.msra.mxu1 %v3390_v50  ;;  %v1675_v17 = vshll.u32 %v3925_v9, 16  ;;  %v3389_v36 = vld [vmem:[%s4217_s1 + $0x188] sm:$0xff]   ;;  %v1682_v31 = vrot.slane %v1680_v24, 1  ;;  %v1767_v35 = vrot.slane %v3925_v9, 1 }
  0x6b   : > { %v1071_v47 = vrot.slane %v1069_v32, 1  ;;  %3199 = vmatprep.subr.bf16.mxu1 %v3393_v60  ;;  %v1113_v51 = vsel %vm454_vm0, %v1111_v53, %v1112_v55  ;;  %v1687_v32 = vshll.u32 %v3950_v25, 16  ;;  %v3403_v53 = vld [vmem:[%s3594_s11 + $0x50] ss:$0 sps:$4 sm:$0x11]  }
  0x6c   : > { %v1677_v23 = vrot.slane %v1675_v17, 1 }
  0x6d   : > { %v1072_v58 = vsel %vm349_vm1, %v1067_v37, %v1071_v47  ;;  %v3969_v47 = vld [vmem:[%s3594_s11 + $0x48] sm:$0xff]  }
  0x6e   : > { %3200 = vmatpush3.bf16.msra.mxu1 %v3393_v60 }
  0x70   : > { %3170 = vmatmul.mubr.bf16.vlgmr.msra.gmra.mxu0 %v1098_v22  ;;  %1383 = vmatmul.mubr.bf16.gmra.mxu1 %v3790_v46  ;;  %v1076_v46 = vshll.u32 %v3875_v40, 16  ;;  %v1671_v22 = vsel %vm349_vm1, %v1666_v16, %v1670_v62  ;;  %v3409_v16 = vld [vmem:[%s3594_s11 + $0x74] ss:$0 sps:$4 sm:$0x11]  }
  0x71   : > { %3026 = vmatpush3.bf16.msra.mxu0 %v3365_v19  ;;  %3173 = vmatprep.mubr.bf16.mxu0 %v1101_v26  ;;  %v1116_v19 = vsel %vm454_vm0, %v1114_v12, %v1115_v13  ;;  %v3399_v26 = vld [vmem:[%s3594_s11 + $0x38] ss:$0 sps:$4 sm:$0x11]   ;;  %v1716_v12 = vshll.u32 %v3403_v53, 16 }
  0x72   : > { %3027 = vmatprep.subr.bf16.mxu0 %v3367_v7  ;;  %1390 = vmatprep.mubr.bf16.mxu1 %v1060_v34  ;;  %v1078_v59 = vrot.slane %v1076_v46, 1  ;;  %v1764_v7 = vrot.slane %v3911_v61, 1  ;;  %v3960_v34 = vld [vmem:[%s3594_s11 + $0x3c] sm:$0xff]   ;;  %v1769_v46 = vsel %vm454_vm0, %v1767_v35, %v1768_v38 }
  0x73   : > { %v1697_v49 = vshrl.u32 %v3960_v34, 16  ;;  %v1718_v4 = vrot.slane %v1716_v12, 1 }
  0x74   : > { %v1079_v2 = vor.u32 %v1078_v59, %v1074_v14  ;;  %v1766_v28 = vsel %vm454_vm0, %v1764_v7, %v1765_v20  ;;  %v1777_v14 = vrot.slane %v3403_v53, 1  ;;  %v1704_v59 = vshll.u32 %v3401_v39, 16 }
  0x75   : > { %3028 = vmatpush3.bf16.msra.mxu0 %v3368_v30  ;;  %v1786_v7 = vrot.slane %v3409_v16, 1 }
  0x76   : > { %3029 = vmatprep.subr.bf16.mxu0 %v3372_v33  ;;  %v1084_v11 = vsel %vm349_vm1, %v1079_v2, %v1083_v3  ;;  %v1692_v33 = vshll.u32 %v3399_v26, 16  ;;  %v1706_v2 = vrot.slane %v1704_v59, 1  ;;  %v1711_v3 = vshll.u32 %v3969_v47, 16 }
  0x78   : > { %3174 = vmatmul.mubr.bf16.gmra.mxu0 %v1104_v45  ;;  %1391 = vmatmul.mubr.bf16.gmra.mxu1 %v3817_v5  ;;  %v3383_v5 = vld [vmem:[%s4217_s1 + $0x1d0] sm:$0xff]   ;;  %v1689_v45 = vrot.slane %v1687_v32, 1  ;;  %v1694_v37 = vrot.slane %v1692_v33, 1 }
  0x79   : > { %3030 = vmatpush3.bf16.msra.mxu0 %v3373_v41  ;;  %3177 = vmatprep.mubr.bf16.mxu0 %v1107_v48  ;;  %v1770_v41 = vrot.slane %v3950_v25, 1  ;;  %v1774_v48 = vrot.slane %v3401_v39, 1 }
  0x7a   : > { %3031 = vmatprep.subr.bf16.mxu0 %v3375_v42  ;;  %1398 = vmatprep.mubr.bf16.mxu1 %v1072_v58  ;;  %v1771_v42 = vrot.slane %v3399_v26, 1  ;;  %v1690_v55 = vor.u32 %v1689_v45, %v1685_v44  ;;  %v1735_v26 = vshll.u32 %v3406_v29, 16  ;;  %v3410_v45 = vld [vmem:[%s4219_s3 + $0x38] sm:$0xff]  }
  0x7b   : > { %3217 = vmatprep.subr.bf16.mxu1 %v3410_v45 }
  0x7c   : > { %v1772_v50 = vsel %vm454_vm0, %v1770_v41, %v1771_v42  ;;  %v1695_v57 = vsel %vm349_vm1, %v1690_v55, %v1694_v37  ;;  %v1752_v41 = vshll.u32 %v3409_v16, 16  ;;  %v3411_v37 = vld [vmem:[%s4219_s3 + $0x30] sm:$0xff]  }
  0x7d   : > { %3032 = vmatpush3.bf16.msra.mxu0 %v3376_v52  ;;  %v1699_v52 = vshll.u32 %v3960_v34, 16 }
  0x7e   : > { %3033 = vmatprep.subr.bf16.mxu0 %v3380_v56  ;;  %v1776_v56 = vrot.slane %v3969_v47, 1 }
  0x7f   : > { %v1701_v58 = vrot.slane %v1699_v52, 1 }
  0x80   : > { %3178 = vmatmul.mubr.bf16.gmra.mxu0 %v1110_v0  ;;  %1399 = vmatmul.mubr.bf16.gmra.mxu1 %v3840_v18  ;;  %v1673_v18 = vshrl.u32 %v3925_v9, 16  ;;  %v1778_v0 = vsel %vm454_vm0, %v1776_v56, %v1777_v14 }
  0x81   : > { %3034 = vmatpush3.bf16.msra.mxu0 %v3381_v1  ;;  %3181 = vmatprep.mubr.bf16.mxu0 %v1113_v51  ;;  %v1702_v1 = vor.u32 %v1701_v58, %v1697_v49  ;;  %v3416_v49 = vld [vmem:[%s4219_s3 + $0x8] sm:$0xff]  }
  0x82   : > { %3035 = vmatprep.subr.bf16.mxu0 %v3383_v5  ;;  %1406 = vmatprep.mubr.bf16.mxu1 %v1084_v11  ;;  %v1678_v30 = vor.u32 %v1677_v23, %v1673_v18  ;;  %v3407_v5 = vld [vmem:[%s3594_s11 + $0x68] ss:$0 sps:$4 sm:$0x11]   ;;  %v1713_v11 = vrot.slane %v1711_v3, 1  ;;  %v1728_v18 = vshll.u32 %v3405_v63, 16 }
  0x83   : > { %v1707_v10 = vsel %vm349_vm1, %v1702_v1, %v1706_v2 }
  0x84   : > { %v1683_v43 = vsel %vm349_vm1, %v1678_v30, %v1682_v31  ;;  %v1737_v30 = vrot.slane %v1735_v26, 1  ;;  %v1740_v31 = vshll.u32 %v3407_v5, 16 }
  0x85   : > { %3036 = vmatpush3.bf16.msra.mxu0 %v3384_v54  ;;  %v1709_v54 = vshrl.u32 %v3969_v47, 16 }
  0x86   : > { %3037 = vmatprep.subr.bf16.mxu0 %v3388_v15  ;;  %v3408_v15 = vld [vmem:[%s3594_s11 + $0x6c] sm:$0xff]   ;;  %v1742_v33 = vrot.slane %v1740_v31, 1 }
  0x87   : > { %v1714_v17 = vor.u32 %v1713_v11, %v1709_v54  ;;  %v1747_v35 = vshll.u32 %v3408_v15, 16  ;;  %v1745_v38 = vshrl.u32 %v3408_v15, 16 }
  0x88   : > { %3182 = vmatmul.mubr.bf16.gmra.mxu0 %v1116_v19  ;;  %1407 = vmatmul.mubr.bf16.gmra.mxu1 %v3875_v40  ;;  %v1773_v40 = vrot.slane %v3960_v34, 1  ;;  %v1785_v19 = vrot.slane %v3408_v15, 1 }
  0x89   : > { %3038 = vmatpush3.bf16.msra.mxu0 %v3389_v36  ;;  %2021 = vmatprep.mubr.bf16.mxu0 %v1671_v22  ;;  %v1719_v20 = vsel %vm349_vm1, %v1714_v17, %v1718_v4  ;;  %v1749_v39 = vrot.slane %v1747_v35, 1 }
  0x8a   : > { %3039 = vmatprep.subr.bf16.mxu0 %v3391_v21  ;;  %3201 = vmatprep.mubr.bf16.mxu1 %v1766_v28  ;;  %v1775_v60 = vsel %vm454_vm0, %v1773_v40, %v1774_v48  ;;  %v1787_v23 = vsel %vm454_vm0, %v1785_v19, %v1786_v7  ;;  %v1733_v28 = vshrl.u32 %v3406_v29, 16  ;;  %v3412_v40 = vld [vmem:[%s4219_s3 + $0x28] sm:$0xff]   ;;  %v3415_v48 = vld [vmem:[%s4219_s3 + $0x10] sm:$0xff]  }
  0x8b   : > { %v1750_v42 = vor.u32 %v1749_v39, %v1745_v38 }
  0x8c   : > { %v1738_v32 = vor.u32 %v1737_v30, %v1733_v28 }
  0x8d   : > { %3040 = vmatpush3.bf16.msra.mxu0 %v3392_v27 }
  0x90   : > { %2022 = vmatmul.mubr.bf16.vlgmr.msra.gmra.mxu0 %v3911_v61  ;;  %3202 = vmatmul.mubr.bf16.vlgmr.msra.gmra.mxu1 %v1769_v46  ;;  %v3404_v61 = vld [vmem:[%s3594_s11 + $0x54] sm:$0xff]   ;;  %s2578_s11 = sshll.u32 %s3440_s18, 4 }
  0x91   : > { %2029 = vmatprep.mubr.bf16.mxu0 %v1683_v43  ;;  %3205 = vmatprep.mubr.bf16.mxu1 %v1772_v50  ;;  %v1779_v51 = vrot.slane %v3404_v61, 1  ;;  %v1723_v36 = vshll.u32 %v3404_v61, 16  ;;  %v1721_v21 = vshrl.u32 %v3404_v61, 16  ;;  %v1754_v43 = vrot.slane %v1752_v41, 1  ;;  %v3414_v46 = vld [vmem:[%s4219_s3 + $0x18] sm:$0xff]   ;;  %v3417_v50 = vld [vmem:[%s4219_s3] sm:$0xff]  }
  0x92   : > { %3218 = vmatpush3.bf16.msra.mxu1 %v3410_v45  ;;  %p241_p6 = scmp.lt.s32.totalorder %s2578_s11, 31 }
  0x93   : > { %v1781_v13 = vsel %vm454_vm0, %v1779_v51, %v1780_v6  ;;  %v1725_v22 = vrot.slane %v1723_v36, 1  ;;  %v1755_v44 = vsel %vm349_vm1, %v1750_v42, %v1754_v43  ;;  %3219 = vmatprep.subr.bf16.mxu1 %v3411_v37 }
  0x94   : > { %s4235_s11 = smov (!%p241_p6, %s2578_s11), 31 }
  0x95   : > { %v1726_v24 = vor.u32 %v1725_v22, %v1721_v21  ;;  %s244_s12 = sadd.s32 %s2579_s13, %s4235_s11 }
  0x96   : > { %3220 = vmatpush3.bf16.msra.mxu1 %v3411_v37  ;;  %s2580_s14 = sshll.u32 %s244_s12, 3 }
  0x97   : > { %3221 = vmatprep.subr.bf16.mxu1 %v3412_v40  ;;  %s4183_s26 = scalar_lea.vmem %s4221_s5, %s2580_s14 }
  0x98   : > { %2030 = vmatmul.mubr.bf16.gmra.mxu0 %v3925_v9  ;;  %3206 = vmatmul.mubr.bf16.gmra.mxu1 %v1775_v60  ;;  %v1783_v9 = vrot.slane %v3407_v5, 1 }
  0x99   : > { %2037 = vmatprep.mubr.bf16.mxu0 %v1695_v57  ;;  %3209 = vmatprep.mubr.bf16.mxu1 %v1778_v0 }
  0x9a   : > { %v1784_v62 = vsel %vm454_vm0, %v1782_v8, %v1783_v9  ;;  %3222 = vmatpush3.bf16.msra.mxu1 %v3412_v40 }
  0xa0   : > { %2038 = vmatmul.mubr.bf16.gmra.mxu0 %v3950_v25  ;;  %3210 = vmatmul.mubr.bf16.gmra.mxu1 %v1781_v13  ;;  %v1730_v25 = vrot.slane %v1728_v18, 1 }
  0xa1   : > { %2045 = vmatprep.mubr.bf16.mxu0 %v1707_v10  ;;  %3213 = vmatprep.mubr.bf16.mxu1 %v1784_v62 }
  0xa2   : > { %v1731_v27 = vsel %vm349_vm1, %v1726_v24, %v1730_v25 }
  0xa8   : > { %2046 = vmatmul.mubr.bf16.gmra.mxu0 %v3960_v34  ;;  %3214 = vmatmul.mubr.bf16.gmra.mxu1 %v1787_v23  ;;  %v1743_v34 = vsel %vm349_vm1, %v1738_v32, %v1742_v33 }
  0xa9   : > { %2053 = vmatprep.mubr.bf16.mxu0 %v1719_v20 }
  0xb0   : > { %2054 = vmatmul.mubr.bf16.gmra.mxu0 %v3969_v47  ;;  %v3413_v47 = vld [vmem:[%s4219_s3 + $0x20] sm:$0xff]  }
  0xb1   : > { %2061 = vmatprep.mubr.bf16.mxu0 %v1731_v27  ;;  %3223 = vmatprep.subr.bf16.mxu1 %v3413_v47 }
  0xb2   : > { %3224 = vmatpush3.bf16.msra.mxu1 %v3413_v47 }
  0xb3   : > { %3225 = vmatprep.subr.bf16.mxu1 %v3414_v46 }
  0xb6   : > { %3226 = vmatpush3.bf16.msra.mxu1 %v3414_v46 }
  0xb7   : > { %3227 = vmatprep.subr.bf16.mxu1 %v3415_v48 }
  0xb8   : > { %2062 = vmatmul.mubr.bf16.gmra.mxu0 %v3404_v61 }
  0xb9   : > { %2069 = vmatprep.mubr.bf16.mxu0 %v1743_v34 }
  0xba   : > { %3228 = vmatpush3.bf16.msra.mxu1 %v3415_v48 }
  0xbb   : > { %3229 = vmatprep.subr.bf16.mxu1 %v3416_v49 }
  0xbe   : > { %3230 = vmatpush3.bf16.msra.mxu1 %v3416_v49 }
  0xbf   : > { %3231 = vmatprep.subr.bf16.mxu1 %v3417_v50 }
  0xc0   : > { %2070 = vmatmul.mubr.bf16.gmra.mxu0 %v3406_v29 }
  0xc1   : > { %2077 = vmatprep.mubr.bf16.mxu0 %v1755_v44 }
  0xc2   : > { %3232 = vmatpush3.bf16.msra.mxu1 %v3417_v50 }
  0xc8   : > { %2078 = vmatmul.mubr.bf16.gmra.mxu0 %v3408_v15 }
  0xf0   : > { %v2881_v52 = vpop.f32.mrf.mxu0  ;;  %v3139_v53 = vpop.f32.mrf.mxu1 }
  0xf2   : > { %v2882_v55 = vpop.f32.mrf.mxu0  ;;  %v810_v56 = vpop.f32.mrf.mxu1 }
  0xf3   : > { %v2883_v14 = vadd.f32 %v2882_v55, %v2881_v52 }
  0xf4   : > { %v2884_v57 = vpop.f32.mrf.mxu0  ;;  %v3140_v58 = vpop.f32.mrf.mxu1 }
  0xf5   : > { %v4025_v59 = vadd.f32 %v2883_v14, %v810_v56 }
  0xf6   : > { %v2885_v60 = vpop.f32.mrf.mxu0  ;;  %v813_v61 = vpop.f32.mrf.mxu1 }
  0xf7   : > { %v2886_v63 = vadd.f32 %v2885_v60, %v2884_v57 }
  0xf8   : > { %v2887_v0 = vpop.f32.mrf.mxu0  ;;  %v3143_v1 = vpop.f32.mrf.mxu1 }
  0xf9   : > { %v4027_v2 = vadd.f32 %v2886_v63, %v813_v61 }
  0xfa   : > { %v2888_v3 = vpop.f32.mrf.mxu0  ;;  %v826_v29 = vpop.f32.mrf.mxu1 }
  0xfb   : > { %v2889_v5 = vadd.f32 %v2888_v3, %v2887_v0 }
  0xfc   : > { %v2890_v51 = vpop.f32.mrf.mxu0  ;;  %v3144_v6 = vpop.f32.mrf.mxu1 }
  0xfd   : > { %v4029_v8 = vadd.f32 %v3139_v53, %v2889_v5 }
  0xfe   : > { %v2891_v9 = vpop.f32.mrf.mxu0  ;;  %v829_v10 = vpop.f32.mrf.mxu1 }
  0xff   : > { %v2892_v54 = vadd.f32 %v2891_v9, %v2890_v51 }
 0x100   : > { %v2893_v11 = vpop.f32.mrf.mxu0  ;;  %v3147_v12 = vpop.f32.mrf.mxu1 }
 0x101   : > { %v4031_v13 = vadd.f32 %v3140_v58, %v2892_v54 }
 0x102   : > { %v2894_v15 = vpop.f32.mrf.mxu0  ;;  %v842_v16 = vpop.f32.mrf.mxu1 }
 0x103   : > { %v2895_v62 = vadd.f32 %v2894_v15, %v2893_v11 }
 0x104   : > { %v2896_v17 = vpop.f32.mrf.mxu0  ;;  %v3148_v4 = vpop.f32.mrf.mxu1 }
 0x105   : > { %v4033_v36 = vadd.f32 %v2895_v62, %v826_v29 }
 0x106   : > { %v2897_v19 = vpop.f32.mrf.mxu0  ;;  %v845_v7 = vpop.f32.mrf.mxu1 }
 0x107   : > { %v2898_v20 = vadd.f32 %v2897_v19, %v2896_v17 }
 0x108   : > { %v2899_v21 = vpop.f32.mrf.mxu0  ;;  %v3151_v18 = vpop.f32.mrf.mxu1 }
 0x109   : > { %v4035_v22 = vadd.f32 %v2898_v20, %v829_v10 }
 0x10a   : > { %v2900_v23 = vpop.f32.mrf.mxu0  ;;  %v858_v25 = vpop.f32.mrf.mxu1 }
 0x10b   : > { %v2901_v24 = vadd.f32 %v2900_v23, %v2899_v21 }
 0x10c   : > { %v2902_v26 = vpop.f32.mrf.mxu0  ;;  %v3152_v28 = vpop.f32.mrf.mxu1 }
 0x10d   : > { %v4037_v27 = vadd.f32 %v3143_v1, %v2901_v24 }
 0x10e   : > { %v2903_v30 = vpop.f32.mrf.mxu0  ;;  %v861_v32 = vpop.f32.mrf.mxu1 }
 0x10f   : > { %v2904_v31 = vadd.f32 %v2903_v30, %v2902_v26 }
 0x110   : > { %v2905_v35 = vpop.f32.mrf.mxu0  ;;  %v2961_v38 = vpop.f32.mrf.mxu1 }
 0x111   : > { %v4039_v33 = vadd.f32 %v3144_v6, %v2904_v31 }
 0x112   : > { %v2906_v34 = vpop.f32.mrf.mxu0  ;;  %v2962_v43 = vpop.f32.mrf.mxu1 }
 0x113   : > { %v2907_v39 = vadd.f32 %v2906_v34, %v2905_v35  ;;  %v2963_v44 = vadd.f32 %v2962_v43, %v2961_v38 }
 0x114   : > { %v2908_v41 = vpop.f32.mrf.mxu0  ;;  %v4043_v37 = vpop.f32.mrf.mxu1 }
 0x115   : > { %v4041_v42 = vadd.f32 %v2907_v39, %v842_v16 }
 0x116   : > { %v2909_v45 = vpop.f32.mrf.mxu0  ;;  %v4047_v48 = vpop.f32.mrf.mxu1 }
 0x117   : > { %v2910_v40 = vadd.f32 %v2909_v45, %v2908_v41 }
 0x118   : > { %v2911_v47 = vpop.f32.mrf.mxu0  ;;  %v2967_v50 = vpop.f32.mrf.mxu1 }
 0x119   : > { %v4045_v46 = vadd.f32 %v2910_v40, %v845_v7 }
 0x11a   : > { %v2912_v49 = vpop.f32.mrf.mxu0  ;;  %v2968_v56 = vpop.f32.mrf.mxu1 }
 0x11b   : > { %v2913_v52 = vadd.f32 %v2912_v49, %v2911_v47 }
 0x11c   : > { %v2914_v53 = vpop.f32.mrf.mxu0  ;;  %v4051_v57 = vpop.f32.mrf.mxu1 }
 0x11d   : > { %v4049_v55 = vadd.f32 %v3147_v12, %v2913_v52 }
 0x11e   : > { %v2915_v14 = vpop.f32.mrf.mxu0  ;;  %v4055_v63 = vpop.f32.mrf.mxu1 }
 0x11f   : > { %v2916_v58 = vadd.f32 %v2915_v14, %v2914_v53 }
 0x120   : > { %v2917_v60 = vpop.f32.mrf.mxu0  ;;  %v2973_v1 = vpop.f32.mrf.mxu1 }
 0x121   : > { %v4053_v61 = vadd.f32 %v3148_v4, %v2916_v58  ;;  %v2969_v4 = vadd.f32 %v2968_v56, %v2967_v50 }
 0x122   : > { %v2918_v0 = vpop.f32.mrf.mxu0  ;;  %v2974_v51 = vpop.f32.mrf.mxu1 }
 0x123   : > { %v2919_v3 = vadd.f32 %v2918_v0, %v2917_v60  ;;  %v2975_v45 = vadd.f32 %v2974_v51, %v2973_v1 }
 0x124   : > { %v2920_v29 = vpop.f32.mrf.mxu0  ;;  %v4059_v9 = vpop.f32.mrf.mxu1 }
 0x125   : > { %v4057_v5 = vadd.f32 %v2919_v3, %v858_v25 }
 0x126   : > { %v2921_v6 = vpop.f32.mrf.mxu0  ;;  %v4063_v12 = vpop.f32.mrf.mxu1 }
 0x127   : > { %v2922_v10 = vadd.f32 %v2921_v6, %v2920_v29 }
 0x128   : > { %v2923_v54 = vpop.f32.mrf.mxu0  ;;  %v2979_v16 = vpop.f32.mrf.mxu1 }
 0x129   : > { %v4061_v11 = vadd.f32 %v2922_v10, %v861_v32 }
 0x12a   : > { %v2924_v15 = vpop.f32.mrf.mxu0  ;;  %v2980_v7 = vpop.f32.mrf.mxu1 }
 0x12b   : > { %v2925_v62 = vadd.f32 %v2924_v15, %v2923_v54 }
 0x12c   : > { %v2926_v17 = vpop.f32.mrf.mxu0  ;;  %v4065_v21 = vpop.f32.mrf.mxu1 }
 0x12d   : > { %v867_v19 = vadd.f32 %v3151_v18, %v2925_v62  ;;  %v2981_v18 = vadd.f32 %v2980_v7, %v2979_v16 }
 0x12e   : > { %v2927_v20 = vpop.f32.mrf.mxu0  ;;  %v4069_v26 = vpop.f32.mrf.mxu1 }
 0x12f   : > { %v2928_v23 = vadd.f32 %v2927_v20, %v2926_v17 }
 0x130   : > { %v3171_v24 = vpop.f32.mrf.mxu0  ;;  %v2985_v32 = vpop.f32.mrf.mxu1 }
 0x131   : > { %v4067_v25 = vadd.f32 %v3152_v28, %v2928_v23  ;;  %v1458_v30 = vadd.f32 %v3171_v24, %v2969_v4 }
 0x132   : > { %v1449_v31 = vpop.f32.mrf.mxu0  ;;  %v2986_v39 = vpop.f32.mrf.mxu1 }
 0x133   : > { %v4072_v35 = vadd.f32 %v1458_v30, %v4029_v8  ;;  %v1450_v34 = vadd.f32 %v2963_v44, %v1449_v31  ;;  %v2987_v60 = vadd.f32 %v2986_v39, %v2985_v32 }
 0x134   : > { %v4074_v38 = vpop.f32.mrf.mxu0  ;;  %v4077_v40 = vpop.f32.mrf.mxu1 }
 0x135   : > { %v1528_v41 = vadd.f32 %v1450_v34, %v4025_v59 }
 0x136   : > { %v1452_v43 = vpop.f32.mrf.mxu0  ;;  %v4079_v47 = vpop.f32.mrf.mxu1 }
 0x138   : > { %v3175_v28 = vpop.f32.mrf.mxu0  ;;  %v2991_v52 = vpop.f32.mrf.mxu1 }
 0x139   : > { %v1474_v49 = vadd.f32 %v3175_v28, %v2981_v18 }
 0x13a   : > { %v1465_v50 = vpop.f32.mrf.mxu0  ;;  %v2992_v56 = vpop.f32.mrf.mxu1 }
 0x13b   : > { %v4082_v8 = vadd.f32 %v1474_v49, %v4037_v27  ;;  %v1466_v44 = vadd.f32 %v2975_v45, %v1465_v50  ;;  %v2993_v59 = vadd.f32 %v2992_v56, %v2991_v52  ;;  %v2966_v56 = vadd.f32 %v4047_v48, %v4043_v37  ;;  %v4126_v37 = vld [vmem:[%s4218_s2] ss:$0 sm:$0xff] }
 0x13c   : > { %v4084_v53 = vpop.f32.mrf.mxu0  ;;  %v4091_v0 = vpop.f32.mrf.mxu1 }
 0x13d   : > { %v4087_v14 = vadd.f32 %v1466_v44, %v4033_v36 }
 0x13e   : > { %v4089_v58 = vpop.f32.mrf.mxu0  ;;  %v4093_v3 = vpop.f32.mrf.mxu1 }
 0x140   : > { %v3179_v1 = vpop.f32.mrf.mxu0  ;;  %v2997_v27 = vpop.f32.mrf.mxu1 }
 0x141   : > { %v1490_v29 = vadd.f32 %v3179_v1, %v2993_v59  ;;  %v1453_v1 = vadd.f32 %v2966_v56, %v1452_v43 }
 0x142   : > { %v1481_v51 = vpop.f32.mrf.mxu0  ;;  %v2998_v36 = vpop.f32.mrf.mxu1 }
 0x143   : > { %v4096_v6 = vadd.f32 %v1490_v29, %v4049_v55  ;;  %v1482_v10 = vadd.f32 %v2987_v60, %v1481_v51  ;;  %v2999_v62 = vadd.f32 %v2998_v36, %v2997_v27  ;;  %v1529_v43 = vadd.f32 %v1453_v1, %v4027_v2 }
 0x144   : > { %v4098_v54 = vpop.f32.mrf.mxu0  ;;  %v4105_v17 = vpop.f32.mrf.mxu1 }
 0x145   : > { %v4101_v15 = vadd.f32 %v1482_v10, %v4041_v42 }
 0x146   : > { %v4103_v16 = vpop.f32.mrf.mxu0  ;;  %v4107_v7 = vpop.f32.mrf.mxu1 }
 0x148   : > { %v3183_v4 = vpop.f32.mrf.mxu0  ;;  %v3003_v23 = vpop.f32.mrf.mxu1 }
 0x14a   : > { %v1497_v20 = vpop.f32.mrf.mxu0  ;;  %v3004_v30 = vpop.f32.mrf.mxu1 }
 0x14b   : > { %v1498_v24 = vadd.f32 %v2999_v62, %v1497_v20  ;;  %v3005_v32 = vadd.f32 %v3004_v30, %v3003_v23 }
 0x14c   : > { %v3184_v55 = vpop.f32.mrf.mxu0  ;;  %v3006_v42 = vpop.f32.mrf.mxu1 }
 0x14d   : > { %v4110_v31 = vadd.f32 %v1498_v24, %v4057_v5  ;;  %v1506_v18 = vadd.f32 %v3183_v4, %v3005_v32  ;;  %v2972_v4 = vadd.f32 %v4055_v63, %v4051_v57 }
 0x14e   : > { %v4112_v34 = vpop.f32.mrf.mxu0  ;;  %v3007_v45 = vpop.f32.mrf.mxu1 }
 0x14f   : > { %v4114_v28 = vadd.f32 %v1506_v18, %v867_v19  ;;  %v3008_v49 = vadd.f32 %v3007_v45, %v3006_v42  ;;  %v1461_v32 = vadd.f32 %v4074_v38, %v2972_v4 }
 0x150   : > { %v3041_v39 = vpop.f32.mrf.mxu0  ;;  %v3203_v44 = vpop.f32.mrf.mxu1 }
 0x151   : > { %v1509_v59 = vadd.f32 %v3184_v55, %v3008_v49  ;;  %v1531_v56 = vadd.f32 %v1461_v32, %v4031_v13 }
 0x152   : > { %v3042_v50 = vpop.f32.mrf.mxu0  ;;  %v2120_v5 = vpop.f32.mrf.mxu1 }
 0x153   : > { %v3043_v52 = vadd.f32 %v3042_v50, %v3041_v39  ;;  %v4119_v29 = vadd.f32 %v1509_v59, %v4067_v25 }
 0x154   : > { %v3044_v60 = vpop.f32.mrf.mxu0  ;;  %v3204_v36 = vpop.f32.mrf.mxu1 }
 0x155   : > { %v2121_v51 = vadd.f32 %v3043_v52, %v2120_v5  ;;  %v2978_v52 = vadd.f32 %v4063_v12, %v4059_v9 }
 0x156   : > { %v3045_v27 = vpop.f32.mrf.mxu0  ;;  %v2123_v48 = vpop.f32.mrf.mxu1 }
 0x157   : > { %v3046_v10 = vadd.f32 %v3045_v27, %v3044_v60  ;;  %v2199_v19 = vadd.f32 %v2121_v51, %v1528_v41 }
 0x158   : > { %v3047_v62 = vpop.f32.mrf.mxu0  ;;  %v3207_v24 = vpop.f32.mrf.mxu1 }
 0x159   : > { %v2124_v20 = vadd.f32 %v3046_v10, %v2123_v48  ;;  %v2254_v55 = vadd.f32 %v4126_v37, %v2199_v19 }
 0x15a   : > { %v3048_v25 = vpop.f32.mrf.mxu0  ;;  %v2136_v18 = vpop.f32.mrf.mxu1 }
 0x15b   : > { %v3049_v23 = vadd.f32 %v3048_v25, %v3047_v62  ;;  %v2200_v30 = vadd.f32 %v2124_v20, %v1529_v43  ;;  %v2270_v49 = vmax.f32 %v2254_v55, 0.0  ;;  %v2984_v43 = vadd.f32 %v4069_v26, %v4065_v21 }
 0x15c   : > { %v3050_v41 = vpop.f32.mrf.mxu0  ;;  %v3208_v38 = vpop.f32.mrf.mxu1 }
 0x15d   : > { %v2129_v42 = vadd.f32 %v3203_v44, %v3049_v23  ;;  %v2255_v57 = vadd.f32 %v4126_v37, %v2200_v30 }
 0x15e   : > { %v3051_v63 = vpop.f32.mrf.mxu0  ;;  %v2139_v4 = vpop.f32.mrf.mxu1 }
 0x15f   : > { %v2201_v39 = vadd.f32 %v2129_v42, %v4072_v35  ;;  %v3052_v45 = vadd.f32 %v3051_v63, %v3050_v41  ;;  %v2271_v2 = vmax.f32 %v2255_v57, 0.0  ;;  %v1469_v35 = vadd.f32 %v2978_v52, %v4089_v58 }
 0x160   : > { %v3053_v50 = vpop.f32.mrf.mxu0  ;;  %v3211_v58 = vpop.f32.mrf.mxu1  ;;  %v1477_v57 = vadd.f32 %v4084_v53, %v2984_v43 }
 0x161   : > { %v2132_v59 = vadd.f32 %v3204_v36, %v3052_v45  ;;  %v2286_v5 = vpack.c.bf16 %v2271_v2, %v2270_v49  ;;  %v2256_v44 = vadd.f32 %v4126_v37, %v2201_v39  ;;  %v1533_v20 = vadd.f32 %v1469_v35, %v4035_v22 }
 0x162   : > { %v3054_v60 = vpop.f32.mrf.mxu0  ;;  %v2152_v39 = vpop.f32.mrf.mxu1  ;;  %v2990_v2 = vadd.f32 %v4079_v47, %v4077_v40 }
 0x163   : > { %v2202_v1 = vadd.f32 %v2132_v59, %v1531_v56  ;;  %v3055_v51 = vadd.f32 %v3054_v60, %v3053_v50  ;;  %3233 = vmatprep.mubr.bf16.mxu1 %v2286_v5  ;;  %v2272_v9 = vmax.f32 %v2256_v44, 0.0  ;;  %v1535_v50 = vadd.f32 %v1477_v57, %v4039_v33 }
 0x164   : > { %v3056_v27 = vpop.f32.mrf.mxu0  ;;  %v3212_v53 = vpop.f32.mrf.mxu1 }
 0x165   : > { %v2257_v10 = vadd.f32 %v4126_v37, %v2202_v1  ;;  %v2137_v19 = vadd.f32 %v3055_v51, %v2136_v18  ;;  %v1485_v1 = vadd.f32 %v2990_v2, %v4103_v16 }
 0x166   : > { %v3057_v62 = vpop.f32.mrf.mxu0  ;;  %v2155_v35 = vpop.f32.mrf.mxu1 }
 0x167   : > { %v2273_v12 = vmax.f32 %v2257_v10, 0.0  ;;  %v2203_v13 = vadd.f32 %v2137_v19, %v4087_v14  ;;  %v3058_v36 = vadd.f32 %v3057_v62, %v3056_v27  ;;  %v2996_v19 = vadd.f32 %v4093_v3, %v4091_v0 }
 0x168   : > { %v3059_v48 = vpop.f32.mrf.mxu0  ;;  %v1537_v62 = vadd.f32 %v1485_v1, %v4045_v46  ;;  %v3215_v16 = vpop.f32.mrf.mxu1 }
 0x169   : > { %v2287_v25 = vpack.c.bf16 %v2273_v12, %v2272_v9  ;;  %v2140_v23 = vadd.f32 %v3058_v36, %v2139_v4  ;;  %v2258_v30 = vadd.f32 %v4126_v37, %v2203_v13 }
 0x16a   : > { %v3060_v55 = vpop.f32.mrf.mxu0 }
 0x16b   : > { %v2204_v41 = vadd.f32 %v2140_v23, %v1533_v20  ;;  %v3061_v32 = vadd.f32 %v3060_v55, %v3059_v48  ;;  %3234 = vmatmul.mubr.bf16.vlgmr.msra.gmra.mxu1 %v2287_v25  ;;  %v2274_v21 = vmax.f32 %v2258_v30, 0.0  ;;  %v2168_v55 = vpop.f32.mrf.mxu1 }
 0x16c   : > { %v3062_v42 = vpop.f32.mrf.mxu0 }
 0x16d   : > { %v2259_v14 = vadd.f32 %v4126_v37, %v2204_v41  ;;  %v2145_v63 = vadd.f32 %v3207_v24, %v3061_v32 }
 0x16e   : > { %v3063_v18 = vpop.f32.mrf.mxu0 }
 0x16f   : > { %v2275_v26 = vmax.f32 %v2259_v14, 0.0  ;;  %v2205_v22 = vadd.f32 %v2145_v63, %v4082_v8  ;;  %v3064_v45 = vadd.f32 %v3063_v18, %v3062_v42  ;;  %v3002_v42 = vadd.f32 %v4107_v7, %v4105_v17 }
 0x170   : > { %v3065_v49 = vpop.f32.mrf.mxu0 }
 0x171   : > { %v2148_v52 = vadd.f32 %v3208_v38, %v3064_v45  ;;  %v2288_v56 = vpack.c.bf16 %v2275_v26, %v2274_v21  ;;  %v2260_v24 = vadd.f32 %v4126_v37, %v2205_v22  ;;  %v1501_v26 = vadd.f32 %v3002_v42, %v4112_v34 }
 0x172   : > { %v3066_v59 = vpop.f32.mrf.mxu0 }
 0x173   : > { %v2206_v60 = vadd.f32 %v2148_v52, %v1535_v50  ;;  %v3067_v5 = vadd.f32 %v3066_v59, %v3065_v49  ;;  %3237 = vmatprep.mubr.bf16.mxu1 %v2288_v56  ;;  %v2276_v47 = vmax.f32 %v2260_v24, 0.0  ;;  %v1541_v52 = vadd.f32 %v1501_v26, %v4061_v11 }
 0x174   : > { %v3068_v44 = vpop.f32.mrf.mxu0 }
 0x175   : > { %v2153_v8 = vadd.f32 %v3067_v5, %v2152_v39  ;;  %v2261_v51 = vadd.f32 %v4126_v37, %v2206_v60 }
 0x176   : > { %v3069_v27 = vpop.f32.mrf.mxu0 }
 0x177   : > { %v2207_v40 = vadd.f32 %v2153_v8, %v4101_v15  ;;  %v3070_v33 = vadd.f32 %v3069_v27, %v3068_v44  ;;  %v2277_v38 = vmax.f32 %v2261_v51, 0.0  ;;  %v1493_v15 = vadd.f32 %v4098_v54, %v2996_v19  ;;  %v3216_v54 = vpop.f32.mrf.mxu1 }
 0x178   : > { %v3071_v10 = vpop.f32.mrf.mxu0 }
 0x179   : > { %v2156_v4 = vadd.f32 %v3070_v33, %v2155_v35  ;;  %v2289_v9 = vpack.c.bf16 %v2277_v38, %v2276_v47  ;;  %v2262_v13 = vadd.f32 %v4126_v37, %v2207_v40  ;;  %v1539_v32 = vadd.f32 %v1493_v15, %v4053_v61  ;;  %v2171_v61 = vpop.f32.mrf.mxu1 }
 0x17a   : > { %v3072_v12 = vpop.f32.mrf.mxu0 }
 0x17b   : > { %v2208_v36 = vadd.f32 %v2156_v4, %v1537_v62  ;;  %v3073_v48 = vadd.f32 %v3072_v12, %v3071_v10  ;;  %3238 = vmatmul.mubr.bf16.gmra.mxu1 %v2289_v9  ;;  %v2278_v0 = vmax.f32 %v2262_v13, 0.0 }
 0x17c   : > { %v3074_v43 = vpop.f32.mrf.mxu0 }
 0x17d   : > { %v2263_v20 = vadd.f32 %v4126_v37, %v2208_v36  ;;  %v2161_v25 = vadd.f32 %v3211_v58, %v3073_v48 }
 0x17e   : > { %v3075_v23 = vpop.f32.mrf.mxu0 }
 0x17f   : > { %v2279_v3 = vmax.f32 %v2263_v20, 0.0  ;;  %v2209_v46 = vadd.f32 %v2161_v25, %v4096_v6  ;;  %v3076_v30 = vadd.f32 %v3075_v23, %v3074_v43 }
 0x180   : > { %v3077_v41 = vpop.f32.mrf.mxu0 }
 0x181   : > { %v2164_v57 = vadd.f32 %v3212_v53, %v3076_v30  ;;  %v2290_v14 = vpack.c.bf16 %v2279_v3, %v2278_v0  ;;  %v2264_v58 = vadd.f32 %v4126_v37, %v2209_v46 }
 0x182   : > { %v3078_v63 = vpop.f32.mrf.mxu0 }
 0x183   : > { %v2210_v18 = vadd.f32 %v2164_v57, %v1539_v32  ;;  %v3079_v39 = vadd.f32 %v3078_v63, %v3077_v41  ;;  %3241 = vmatprep.mubr.bf16.mxu1 %v2290_v14  ;;  %v2280_v7 = vmax.f32 %v2264_v58, 0.0 }
 0x184   : > { %v3080_v21 = vpop.f32.mrf.mxu0 }
 0x185   : > { %v2169_v6 = vadd.f32 %v3079_v39, %v2168_v55  ;;  %v2265_v22 = vadd.f32 %v4126_v37, %v2210_v18 }
 0x186   : > { %v3081_v45 = vpop.f32.mrf.mxu0 }
 0x187   : > { %v2211_v49 = vadd.f32 %v2169_v6, %v4110_v31  ;;  %v3082_v17 = vadd.f32 %v3081_v45, %v3080_v21  ;;  %v2281_v2 = vmax.f32 %v2265_v22, 0.0 }
 0x188   : > { %v3083_v50 = vpop.f32.mrf.mxu0 }
 0x189   : > { %v2172_v56 = vadd.f32 %v3082_v17, %v2171_v61  ;;  %v2291_v59 = vpack.c.bf16 %v2281_v2, %v2280_v7  ;;  %v2266_v60 = vadd.f32 %v4126_v37, %v2211_v49 }
 0x18a   : > { %v3084_v53 = vpop.f32.mrf.mxu0 }
 0x18b   : > { %v2212_v5 = vadd.f32 %v2172_v56, %v1541_v52  ;;  %v3085_v34 = vadd.f32 %v3084_v53, %v3083_v50  ;;  %3242 = vmatmul.mubr.bf16.gmra.mxu1 %v2291_v59  ;;  %v2282_v8 = vmax.f32 %v2266_v60, 0.0 }
 0x18c   : > { %v3086_v24 = vpop.f32.mrf.mxu0 }
 0x18d   : > { %v2267_v44 = vadd.f32 %v4126_v37, %v2212_v5  ;;  %v2177_v1 = vadd.f32 %v3215_v16, %v3085_v34 }
 0x18e   : > { %v3087_v31 = vpop.f32.mrf.mxu0 }
 0x18f   : > { %v2283_v51 = vmax.f32 %v2267_v44, 0.0  ;;  %v2213_v27 = vadd.f32 %v2177_v1, %v4114_v28  ;;  %v3088_v11 = vadd.f32 %v3087_v31, %v3086_v24  ;;  %v2853_v28 = vld [vmem:[%s4220_s4] ss:$0 sm:$0xff] }
 0x191   : > { %v2180_v35 = vadd.f32 %v3216_v54, %v3088_v11  ;;  %v2292_v40 = vpack.c.bf16 %v2283_v51, %v2282_v8  ;;  %v2268_v47 = vadd.f32 %v4126_v37, %v2213_v27 }
 0x193   : > { %v2214_v33 = vadd.f32 %v2180_v35, %v4119_v29  ;;  %3245 = vmatprep.mubr.bf16.mxu1 %v2292_v40  ;;  %v2284_v10 = vmax.f32 %v2268_v47, 0.0 }
 0x195   : > { %v2269_v38 = vadd.f32 %v4126_v37, %v2214_v33 }
 0x197   : > { %v2285_v19 = vmax.f32 %v2269_v38, 0.0 }
 0x199   : > { %v2293_v62 = vpack.c.bf16 %v2285_v19, %v2284_v10 }
 0x19b   : > { %3246 = vmatmul.mubr.bf16.gmra.mxu1 %v2293_v62 }
 0x22b   : > { %v3235_v29 = vpop.f32.mrf.mxu1 }
 0x22c   : > { %v2408_v37 = vadd.f32 %v3235_v29, %v2853_v28 }
 0x22d   : > { %v2399_v4 = vpop.f32.mrf.mxu1 }
 0x22e   : > { %2464 = vst [vmem:[%s4183_s26 + $0x10] sm:$0xff] %v2408_v37  ;;  %v2400_v9 = vadd.f32 %v2853_v28, %v2399_v4 }
 0x22f   : > { %v3236_v12 = vpop.f32.mrf.mxu1 }
 0x230   : > { %2462 = vst [vmem:[%s4183_s26] sm:$0xff] %v2400_v9  ;;  %v2411_v16 = vadd.f32 %v3236_v12, %v2853_v28 }
 0x231   : > { %v2402_v13 = vpop.f32.mrf.mxu1 }
 0x232   : > { %2465 = vst [vmem:[%s4183_s26 + $0x18] sm:$0xff] %v2411_v16  ;;  %v2403_v36 = vadd.f32 %v2853_v28, %v2402_v13 }
 0x234   : > { %2463 = vst [vmem:[%s4183_s26 + $0x8] sm:$0xff] %v2403_v36 }
 0x23b   : > { %v3239_v48 = vpop.f32.mrf.mxu1 }
 0x23c   : > { %v2424_v43 = vadd.f32 %v3239_v48, %v2853_v28 }
 0x23d   : > { %v2415_v15 = vpop.f32.mrf.mxu1 }
 0x23e   : > { %2468 = vst [vmem:[%s4183_s26 + $0x30] sm:$0xff] %v2424_v43  ;;  %v2416_v20 = vadd.f32 %v2853_v28, %v2415_v15 }
 0x23f   : > { %v3240_v25 = vpop.f32.mrf.mxu1 }
 0x240   : > { %2466 = vst [vmem:[%s4183_s26 + $0x20] sm:$0xff] %v2416_v20  ;;  %v2427_v23 = vadd.f32 %v3240_v25, %v2853_v28 }
 0x241   : > { %v2418_v55 = vpop.f32.mrf.mxu1 }
 0x242   : > { %2469 = vst [vmem:[%s4183_s26 + $0x38] sm:$0xff] %v2427_v23  ;;  %v2419_v0 = vadd.f32 %v2853_v28, %v2418_v55 }
 0x244   : > { %2467 = vst [vmem:[%s4183_s26 + $0x28] sm:$0xff] %v2419_v0 }
 0x24b   : > { %v3243_v3 = vpop.f32.mrf.mxu1 }
 0x24c   : > { %v2440_v46 = vadd.f32 %v3243_v3, %v2853_v28 }
 0x24d   : > { %v2431_v30 = vpop.f32.mrf.mxu1 }
 0x24e   : > { %2472 = vst [vmem:[%s4183_s26 + $0x50] sm:$0xff] %v2440_v46  ;;  %v2432_v41 = vadd.f32 %v2853_v28, %v2431_v30 }
 0x24f   : > { %v3244_v32 = vpop.f32.mrf.mxu1 }
 0x250   : > { %2470 = vst [vmem:[%s4183_s26 + $0x40] sm:$0xff] %v2432_v41  ;;  %v2443_v42 = vadd.f32 %v3244_v32, %v2853_v28 }
 0x251   : > { %v2434_v57 = vpop.f32.mrf.mxu1 }
 0x252   : > { %2473 = vst [vmem:[%s4183_s26 + $0x58] sm:$0xff] %v2443_v42  ;;  %v2435_v14 = vadd.f32 %v2853_v28, %v2434_v57 }
 0x254   : > { %2471 = vst [vmem:[%s4183_s26 + $0x48] sm:$0xff] %v2435_v14 }
 0x25b   : > { %v3247_v63 = vpop.f32.mrf.mxu1 }
 0x25c   : > { %v2456_v54 = vadd.f32 %v3247_v63, %v2853_v28 }
 0x25d   : > { %v2447_v18 = vpop.f32.mrf.mxu1 }
 0x25e   : > { %2476 = vst [vmem:[%s4183_s26 + $0x70] sm:$0xff] %v2456_v54  ;;  %v2448_v39 = vadd.f32 %v2853_v28, %v2447_v18 }
 0x25f   : > { %v3248_v58 = vpop.f32.mrf.mxu1 }
 0x260   : > { %2474 = vst [vmem:[%s4183_s26 + $0x60] sm:$0xff] %v2448_v39  ;;  %v2459_v21 = vadd.f32 %v3248_v58, %v2853_v28 }
 0x261   : > { %v2450_v26 = vpop.f32.mrf.mxu1 }
 0x262   : > { %2477 = vst [vmem:[%s4183_s26 + $0x78] sm:$0xff] %v2459_v21  ;;  %v2451_v6 = vadd.f32 %v2853_v28, %v2450_v26 }
 0x264   : > { %2475 = vst [vmem:[%s4183_s26 + $0x68] sm:$0xff] %v2451_v6 }
 0x265 PF: > { %s15_s22 = sadd.s32 1, %s3456_s22   ;;  %s4222_s18 = smov %s3448_s20 }
 0x266   : > { %p12_p7 = scmp.ge.s32.totalorder %s15_s22, 6   ;;  %s4223_s19 = smov %s3452_s21 }
 0x267   : > { %s4224_s20 = smov %s4227_s23  ;;  %s4225_s21 = smov %s4231_s24 }
 0x268   :  { %14 = sbr.rel (!%p12_p7) target bundleno = 3 (0x3), region = 75 }

</bundles_post_ra>
